<compile_context>
chip_gen: v5e
topology: v5e:2x2
jax: 0.10.0
libtpu: 0.0.40
codegen_flags: <defaults>
</compile_context>

<pallas_src>
import math
import functools
import numpy as np

import jax
import jax.numpy as jnp
from jax.experimental import pallas as pl
from jax.experimental.pallas import tpu as pltpu

ETA = 1e-6  # Constants.eta


# ---------------------------------------------------------------------------
# trace-time helpers (become VPU/EUP/MXU ops inside the kernel)
# ---------------------------------------------------------------------------
def _layernorm(x, g, b, eps=1e-5):
    mu = jnp.mean(x, axis=-1, keepdims=True)
    var = jnp.mean((x - mu) ** 2, axis=-1, keepdims=True)
    return (x - mu) * jax.lax.rsqrt(var + eps) * g + b


def _softmax(x, axis=-1, approx_recip=False):
    m = jnp.max(x, axis=axis, keepdims=True)
    e = jnp.exp(x - m)
    s = jnp.sum(e, axis=axis, keepdims=True)
    if approx_recip:
        return e * pl.reciprocal(s, approx=True)
    return e / s


def _gelu(x):
    c = math.sqrt(2.0 / math.pi)
    return 0.5 * x * (1.0 + jnp.tanh(c * (x + 0.044715 * x * x * x)))


# ---------------------------------------------------------------------------
# Pallas kernel: grid = (batch_blocks ["parallel"], num_layers ["arbitrary"])
# The residual stream h persists in VMEM scratch across the layer axis.
# ---------------------------------------------------------------------------
def enc_transformer_kernel(x_ref, maskadd_ref, pe_ref,
                           skelW_ref, skelb_ref,
                           Wqkv_ref, bqkv_ref, Wo_ref, bo_ref,
                           ln1g_ref, ln1b_ref,
                           W1_ref, b1_ref, W2_ref, b2_ref,
                           ln2g_ref, ln2b_ref,
                           muW_ref, mub_ref, lvW_ref, lvb_ref,
                           out_ref, h_ref,
                           *, num_heads, eta):
    layer = pl.program_id(1)
    n_layers = pl.num_programs(1)

    bb, S, F_in = x_ref.shape
    d = pe_ref.shape[-1]
    H = num_heads
    dh = d // H
    N = bb * S
    bf16 = jnp.bfloat16

    # ---- first layer step only: skel embedding + positional encoding into scratch ----
    @pl.when(layer == 0)
    def _():
        x = x_ref[...].reshape(N, F_in).astype(bf16)
        h0 = jnp.dot(x, skelW_ref[...],
                     preferred_element_type=jnp.float32) + skelb_ref[...]       # [N, d]
        h0 = (h0.reshape(bb, S, d) + pe_ref[...][None, :, :]).reshape(N, d)
        h_ref[...] = h0

    h = h_ref[...]                              # [N, d] f32 residual stream
    maskadd = maskadd_ref[...]                  # [bb, 1, S] additive key-padding mask

    # ---- multi-head self-attention (post-norm TransformerEncoderLayer) ----
    qkv = jnp.dot(h.astype(bf16), Wqkv_ref[0],
                  preferred_element_type=jnp.float32) + bqkv_ref[0]             # [N, 3d]
    qkv = qkv.reshape(bb, S, 3 * d)
    Wo = Wo_ref[0]                              # [d, d] bf16

    attn = jnp.zeros((N, d), jnp.float32)
    for hd in range(H):
        # heads are contiguous lane-column slices -> no swapaxes / relayouts
        q_h = qkv[:, :, hd * dh:(hd + 1) * dh].astype(bf16)       # scale pre-folded into Wqkv
        k_h = qkv[:, :, d + hd * dh:d + (hd + 1) * dh].astype(bf16)
        v_h = qkv[:, :, 2 * d + hd * dh:2 * d + (hd + 1) * dh].astype(bf16)
        s = jnp.einsum('bqd,bkd->bqk', q_h, k_h,
                       preferred_element_type=jnp.float32) + maskadd            # [bb,S,S]
        p = _softmax(s, axis=-1, approx_recip=True)
        o_h = jnp.einsum('bqk,bkd->bqd', p.astype(bf16), v_h,
                         preferred_element_type=jnp.float32)                    # [bb,S,dh]
        # head merge folded into the output projection (rows of Wo), no concat needed
        attn = attn + jnp.dot(o_h.reshape(N, dh).astype(bf16),
                              Wo[hd * dh:(hd + 1) * dh, :],
                              preferred_element_type=jnp.float32)
    attn = attn + bo_ref[0]
    h = _layernorm(h + attn, ln1g_ref[0], ln1b_ref[0])

    # ---- feed-forward ----
    ff = jnp.dot(h.astype(bf16), W1_ref[0],
                 preferred_element_type=jnp.float32) + b1_ref[0]
    ff = _gelu(ff)
    ff = jnp.dot(ff.astype(bf16), W2_ref[0],
                 preferred_element_type=jnp.float32) + b2_ref[0]
    h = _layernorm(h + ff, ln2g_ref[0], ln2b_ref[0])
    h_ref[...] = h

    # ---- last layer step only: mean-pool over frames + mu / logvar heads ----
    @pl.when(layer == n_layers - 1)
    def _():
        z = jnp.mean(h.reshape(bb, S, d), axis=1)                               # [bb, d]
        zb = z.astype(bf16)
        mu = jnp.dot(zb, muW_ref[...], preferred_element_type=jnp.float32) + mub_ref[...]
        lv_raw = jnp.dot(zb, lvW_ref[...], preferred_element_type=jnp.float32) + lvb_ref[...]
        lv = _softmax(lv_raw, axis=-1, approx_recip=False) + eta                # matches head
        # slice stores into one lane-dense output block (no concatenate)
        out_ref[:, :, :d] = mu[:, None, :]
        out_ref[:, :, d:] = lv[:, None, :]


# ---------------------------------------------------------------------------
# wrapper
# ---------------------------------------------------------------------------
def positional_encoding(seq_len, d_model):
    pos = np.arange(seq_len, dtype=np.float32)[:, None]
    div = np.exp(np.arange(0, d_model, 2, dtype=np.float32) * (-math.log(10000.0) / d_model))
    pe = np.zeros((seq_len, d_model), np.float32)
    pe[:, 0::2] = np.sin(pos * div)
    pe[:, 1::2] = np.cos(pos * div)
    return jnp.asarray(pe)


def enc_transformer_forward(x, mask, params, *, num_layers, num_heads, eta=ETA,
                            batch_block=None, vmem_limit_bytes=32 * 1024 * 1024):
    """x: [bs, nframes, njoints, nfeats] float; mask: [bs, nframes] bool."""
    bs, S, nj, nf = x.shape
    F_in = nj * nf
    d = params["skel_b"].shape[-1]
    ff = params["W1"].shape[-1]
    L = num_layers
    assert d % num_heads == 0, "out_dim must be divisible by num_heads"
    dh = d // num_heads
    scale = 1.0 / math.sqrt(dh)

    if batch_block is None:
        batch_block = bs                 # batch folding (single block) on 1-TC chips
    assert bs % batch_block == 0
    nb = bs // batch_block
    bb = batch_block

    f32, bf16 = jnp.float32, jnp.bfloat16

    x2 = x.astype(f32).reshape(bs, S, F_in)
    # src_key_padding_mask = ~mask -> additive -1e9 (no fully-masked rows expected)
    maskadd = jnp.where(mask, 0.0, -1e9).astype(f32).reshape(bs, 1, S)
    pe = positional_encoding(S, d)

    # fold the 1/sqrt(dh) attention scale into the Q columns of the QKV projection
    Wqkv = params["Wqkv"].astype(f32).at[:, :, :d].multiply(scale)
    bqkv = params["bqkv"].astype(f32).at[:, :d].multiply(scale)

    inputs = (
        x2, maskadd, pe,
        params["skel_W"].astype(bf16), params["skel_b"].astype(f32),
        Wqkv.astype(bf16), bqkv.reshape(L, 1, 3 * d),
        params["Wo"].astype(bf16), params["bo"].reshape(L, 1, d).astype(f32),
        params["ln1_g"].reshape(L, 1, d).astype(f32),
        params["ln1_b"].reshape(L, 1, d).astype(f32),
        params["W1"].astype(bf16), params["b1"].reshape(L, 1, ff).astype(f32),
        params["W2"].astype(bf16), params["b2"].reshape(L, 1, d).astype(f32),
        params["ln2_g"].reshape(L, 1, d).astype(f32),
        params["ln2_b"].reshape(L, 1, d).astype(f32),
        params["mu_W"].astype(bf16), params["mu_b"].astype(f32),
        params["lv_W"].astype(bf16), params["lv_b"].astype(f32),
    )

    def whole2(shape):
        return pl.BlockSpec(shape, lambda b, l: (0, 0))

    def per_layer3(shape):
        return pl.BlockSpec(shape, lambda b, l: (l, 0, 0))

    def per_batch3(shape):
        return pl.BlockSpec(shape, lambda b, l: (b, 0, 0))

    in_specs = [
        per_batch3((bb, S, F_in)),        # x2
        per_batch3((bb, 1, S)),           # maskadd
        whole2((S, d)),                   # pe
        whole2((F_in, d)),                # skel_W
        whole2((1, d)),                   # skel_b
        per_layer3((1, d, 3 * d)),        # Wqkv   (streamed / double-buffered per layer)
        per_layer3((1, 1, 3 * d)),        # bqkv
        per_layer3((1, d, d)),            # Wo
        per_layer3((1, 1, d)),            # bo
        per_layer3((1, 1, d)),            # ln1_g
        per_layer3((1, 1, d)),            # ln1_b
        per_layer3((1, d, ff)),           # W1
        per_layer3((1, 1, ff)),           # b1
        per_layer3((1, ff, d)),           # W2
        per_layer3((1, 1, d)),            # b2
        per_layer3((1, 1, d)),            # ln2_g
        per_layer3((1, 1, d)),            # ln2_b
        whole2((d, d)),                   # mu_W
        whole2((1, d)),                   # mu_b
        whole2((d, d)),                   # lv_W
        whole2((1, d)),                   # lv_b
    ]
    out_spec = pl.BlockSpec((bb, 1, 2 * d), lambda b, l: (b, 0, 0))

    kernel = functools.partial(enc_transformer_kernel, num_heads=num_heads, eta=eta)

    out = pl.pallas_call(
        kernel,
        grid_spec=pltpu.PrefetchScalarGridSpec(
            num_scalar_prefetch=0,
            grid=(nb, L),
            in_specs=in_specs,
            out_specs=out_spec,
            scratch_shapes=[pltpu.VMEM((bb * S, d), jnp.float32)],   # persistent residual h
        ),
        out_shape=jax.ShapeDtypeStruct((bs, 1, 2 * d), jnp.float32),
        compiler_params=pltpu.CompilerParams(
            dimension_semantics=("parallel", "arbitrary"),
            vmem_limit_bytes=vmem_limit_bytes),
    )(*inputs)

    out = out.reshape(bs, 2 * d)
    return out[:, :d], out[:, d:]


# ---------------------------------------------------------------------------
# pure-JAX reference (f32, same tanh-GELU / masking semantics) for validation
# ---------------------------------------------------------------------------
def enc_transformer_reference(x, mask, params, *, num_layers, num_heads, eta=ETA):
    bs, S, nj, nf = x.shape
    F_in = nj * nf
    d = params["skel_b"].shape[-1]
    H = num_heads
    dh = d // H
    scale = 1.0 / math.sqrt(dh)

    x2 = x.astype(jnp.float32).reshape(bs, S, F_in)
    maskadd = jnp.where(mask, 0.0, -1e9).astype(jnp.float32)[:, None, None, :]   # [bs,1,1,S]
    pe = positional_encoding(S, d)

    h = x2 @ params["skel_W"] + params["skel_b"] + pe[None]
    for l in range(num_layers):
        qkv = h @ params["Wqkv"][l] + params["bqkv"][l]
        q, k, v = qkv[..., :d], qkv[..., d:2 * d], qkv[..., 2 * d:]

        def split(t):
            return t.reshape(bs, S, H, dh).transpose(0, 2, 1, 3)

        qh, kh, vh = split(q), split(k), split(v)
        s = jnp.einsum('bhqd,bhkd->bhqk', qh, kh) * scale + maskadd
        p = jax.nn.softmax(s, axis=-1)
        o = jnp.einsum('bhqk,bhkd->bhqd', p, vh).transpose(0, 2, 1, 3).reshape(bs, S, d)
        attn = o @ params["Wo"][l] + params["bo"][l]
        h = _layernorm(h + attn, params["ln1_g"][l], params["ln1_b"][l])
        ffa = _gelu(h @ params["W1"][l] + params["b1"][l])
        ffa = ffa @ params["W2"][l] + params["b2"][l]
        h = _layernorm(h + ffa, params["ln2_g"][l], params["ln2_b"][l])

    z = h.mean(axis=1)
    mu = z @ params["mu_W"] + params["mu_b"]
    lv = jax.nn.softmax(z @ params["lv_W"] + params["lv_b"], axis=-1) + eta
    return mu, lv


def init_params(key, *, input_feats, out_dim, ff_size, num_layers):
    d, ff, L = out_dim, ff_size, num_layers

    def lin(k, fan_in, shape):
        bound = 1.0 / math.sqrt(fan_in)
        return jax.random.uniform(k, shape, jnp.float32, -bound, bound)

    ks = jax.random.split(key, 16)
    return {
        "skel_W": lin(ks[0], input_feats, (input_feats, d)),
        "skel_b": lin(ks[1], input_feats, (1, d)),
        "Wqkv":   lin(ks[2], d, (L, d, 3 * d)),
        "bqkv":   lin(ks[3], d, (L, 3 * d)),
        "Wo":     lin(ks[4], d, (L, d, d)),
        "bo":     lin(ks[5], d, (L, d)),
        "ln1_g":  jnp.ones((L, d), jnp.float32),
        "ln1_b":  jnp.zeros((L, d), jnp.float32),
        "W1":     lin(ks[6], d, (L, d, ff)),
        "b1":     lin(ks[7], d, (L, ff)),
        "W2":     lin(ks[8], ff, (L, ff, d)),
        "b2":     lin(ks[9], ff, (L, d)),
        "ln2_g":  jnp.ones((L, d), jnp.float32),
        "ln2_b":  jnp.zeros((L, d), jnp.float32),
        "mu_W":   lin(ks[10], d, (d, d)),
        "mu_b":   lin(ks[11], d, (1, d)),
        "lv_W":   lin(ks[12], d, (d, d)),
        "lv_b":   lin(ks[13], d, (1, d)),
    }


if __name__ == "__main__":
    # Small config consistent with the module:
    #   latent_dim=32, latent_private=None -> out_dim=32
    #   data_dim = [nframes, njoints, nfeats] = [8, 4, 3] -> input_feats=12
    #   ff_size=64, num_layers=2, num_heads=2
    bs, nframes, njoints, nfeats = 2, 8, 4, 3
    out_dim, ff_size, num_layers, num_heads = 32, 64, 2, 2
    input_feats = njoints * nfeats

    key = jax.random.PRNGKey(0)
    kx, kp = jax.random.split(key)

    x = jax.random.normal(kx, (bs, nframes, njoints, nfeats), jnp.float32)
    mask = jnp.ones((bs, nframes), dtype=bool)   # forward default: all-ones mask
    params = init_params(kp, input_feats=input_feats, out_dim=out_dim,
                         ff_size=ff_size, num_layers=num_layers)

    # default: whole batch folded into one block (1-TC chips)
    mu, logvar = enc_transformer_forward(x, mask, params,
                                         num_layers=num_layers, num_heads=num_heads)
    mu, logvar = jax.block_until_ready((mu, logvar))

    # batch-split path (v7x megacore "parallel" axis) must agree with the folded-batch path
    mu1, lv1 = enc_transformer_forward(x, mask, params, num_layers=num_layers,
                                       num_heads=num_heads, batch_block=1)
    mu1, lv1 = jax.block_until_ready((mu1, lv1))

    mu_ref, lv_ref = enc_transformer_reference(x, mask, params,
                                               num_layers=num_layers, num_heads=num_heads)

    assert mu.shape == (bs, out_dim) and logvar.shape == (bs, out_dim)
    assert bool(jnp.all(jnp.isfinite(mu))) and bool(jnp.all(jnp.isfinite(logvar)))
    # logvar = softmax(...) + eta  =>  rows sum to 1 + d*eta
    assert bool(jnp.allclose(jnp.sum(logvar, axis=-1), 1.0 + out_dim * ETA, atol=1e-4))
    # batch-blocked grid gives the same answer as the folded batch
    assert bool(jnp.max(jnp.abs(mu - mu1)) < 1e-4)
    assert bool(jnp.max(jnp.abs(logvar - lv1)) < 1e-4)
    # agrees with the f32 pure-JAX reference within bf16 tolerance
    assert bool(jnp.max(jnp.abs(mu - mu_ref)) < 1e-1)
    assert bool(jnp.max(jnp.abs(logvar - lv_ref)) < 2e-2)
    print("KERNEL_OK")
</pallas_src>

<mosaic_0001>
module attributes {stable_mosaic.version = 11 : i64} {
  func.func @enc_transformer_kernel(%arg0: i32, %arg1: i32, %arg2: memref<2x8x12xf32, #tpu.memory_space<vmem>>, %arg3: memref<2x1x8xf32, #tpu.memory_space<vmem>>, %arg4: memref<8x32xf32, #tpu.memory_space<vmem>>, %arg5: memref<12x32xbf16, #tpu.memory_space<vmem>>, %arg6: memref<1x32xf32, #tpu.memory_space<vmem>>, %arg7: memref<1x32x96xbf16, #tpu.memory_space<vmem>>, %arg8: memref<1x1x96xf32, #tpu.memory_space<vmem>>, %arg9: memref<1x32x32xbf16, #tpu.memory_space<vmem>>, %arg10: memref<1x1x32xf32, #tpu.memory_space<vmem>>, %arg11: memref<1x1x32xf32, #tpu.memory_space<vmem>>, %arg12: memref<1x1x32xf32, #tpu.memory_space<vmem>>, %arg13: memref<1x32x64xbf16, #tpu.memory_space<vmem>>, %arg14: memref<1x1x64xf32, #tpu.memory_space<vmem>>, %arg15: memref<1x64x32xbf16, #tpu.memory_space<vmem>>, %arg16: memref<1x1x32xf32, #tpu.memory_space<vmem>>, %arg17: memref<1x1x32xf32, #tpu.memory_space<vmem>>, %arg18: memref<1x1x32xf32, #tpu.memory_space<vmem>>, %arg19: memref<32x32xbf16, #tpu.memory_space<vmem>>, %arg20: memref<1x32xf32, #tpu.memory_space<vmem>>, %arg21: memref<32x32xbf16, #tpu.memory_space<vmem>>, %arg22: memref<1x32xf32, #tpu.memory_space<vmem>>, %arg23: memref<2x1x64xf32, #tpu.memory_space<vmem>>, %arg24: memref<16x32xf32, #tpu.memory_space<vmem>>) attributes {dimension_semantics = [#tpu.dimension_semantics<parallel>, #tpu.dimension_semantics<arbitrary>], iteration_bounds = array<i64: 1, 2>, scalar_prefetch = 0 : i64, scratch_operands = 1 : i64, tpu.core_type = #tpu.core_type<tc>, window_params = [{transform_indices = @transform_0, window_bounds = array<i64: 2, 8, 12>}, {transform_indices = @transform_1, window_bounds = array<i64: 2, 1, 8>}, {pipeline_mode = #tpu.pipeline_mode<synchronous>, transform_indices = @transform_2, window_bounds = array<i64: 8, 32>}, {pipeline_mode = #tpu.pipeline_mode<synchronous>, transform_indices = @transform_3, window_bounds = array<i64: 12, 32>}, {pipeline_mode = #tpu.pipeline_mode<synchronous>, transform_indices = @transform_4, window_bounds = array<i64: 1, 32>}, {transform_indices = @transform_5, window_bounds = array<i64: 1, 32, 96>}, {transform_indices = @transform_6, window_bounds = array<i64: 1, 1, 96>}, {transform_indices = @transform_7, window_bounds = array<i64: 1, 32, 32>}, {transform_indices = @transform_8, window_bounds = array<i64: 1, 1, 32>}, {transform_indices = @transform_9, window_bounds = array<i64: 1, 1, 32>}, {transform_indices = @transform_10, window_bounds = array<i64: 1, 1, 32>}, {transform_indices = @transform_11, window_bounds = array<i64: 1, 32, 64>}, {transform_indices = @transform_12, window_bounds = array<i64: 1, 1, 64>}, {transform_indices = @transform_13, window_bounds = array<i64: 1, 64, 32>}, {transform_indices = @transform_14, window_bounds = array<i64: 1, 1, 32>}, {transform_indices = @transform_15, window_bounds = array<i64: 1, 1, 32>}, {transform_indices = @transform_16, window_bounds = array<i64: 1, 1, 32>}, {pipeline_mode = #tpu.pipeline_mode<synchronous>, transform_indices = @transform_17, window_bounds = array<i64: 32, 32>}, {pipeline_mode = #tpu.pipeline_mode<synchronous>, transform_indices = @transform_18, window_bounds = array<i64: 1, 32>}, {pipeline_mode = #tpu.pipeline_mode<synchronous>, transform_indices = @transform_19, window_bounds = array<i64: 32, 32>}, {pipeline_mode = #tpu.pipeline_mode<synchronous>, transform_indices = @transform_20, window_bounds = array<i64: 1, 32>}, {transform_indices = @transform_21, window_bounds = array<i64: 2, 1, 64>}]} {
    %c0_i32 = arith.constant 0 : i32
    %0 = arith.cmpi eq, %arg1, %c0_i32 : i32
    %1 = arith.extui %0 : i1 to i32
    %c0_i32_0 = arith.constant 0 : i32
    %2 = arith.cmpi ne, %1, %c0_i32_0 : i32
    scf.if %2 {
      %c0_71 = arith.constant 0 : index
      %c0_72 = arith.constant 0 : index
      %c0_73 = arith.constant 0 : index
      %160 = vector.load %arg2[%c0_71, %c0_72, %c0_73] : memref<2x8x12xf32, #tpu.memory_space<vmem>>, vector<2x8x12xf32>
      %161 = vector.shape_cast %160 : vector<2x8x12xf32> to vector<16x12xf32>
      %162 = arith.truncf %161 : vector<16x12xf32> to vector<16x12xbf16>
      %c0_74 = arith.constant 0 : index
      %c0_75 = arith.constant 0 : index
      %163 = vector.load %arg5[%c0_74, %c0_75] : memref<12x32xbf16, #tpu.memory_space<vmem>>, vector<12x32xbf16>
      %cst_76 = arith.constant dense<0.000000e+00> : vector<16x32xf32>
      %164 = tpu.matmul %162, %163, %cst_76 {dimension_numbers = #tpu.dot_dimension_numbers<[1], [0], [0], [1], [0, 0, 1, 1], [], []>} : vector<16x12xbf16>, vector<12x32xbf16>, vector<16x32xf32> -> vector<16x32xf32>
      %c0_77 = arith.constant 0 : index
      %c0_78 = arith.constant 0 : index
      %165 = vector.load %arg6[%c0_77, %c0_78] : memref<1x32xf32, #tpu.memory_space<vmem>>, vector<1x32xf32>
      %166 = vector.broadcast %165 : vector<1x32xf32> to vector<16x32xf32>
      %167 = arith.addf %164, %166 : vector<16x32xf32>
      %168 = vector.shape_cast %167 : vector<16x32xf32> to vector<2x8x32xf32>
      %c0_79 = arith.constant 0 : index
      %c0_80 = arith.constant 0 : index
      %169 = vector.load %arg4[%c0_79, %c0_80] : memref<8x32xf32, #tpu.memory_space<vmem>>, vector<8x32xf32>
      %170 = vector.shape_cast %169 : vector<8x32xf32> to vector<1x8x32xf32>
      %171 = vector.broadcast %170 : vector<1x8x32xf32> to vector<2x8x32xf32>
      %172 = arith.addf %168, %171 : vector<2x8x32xf32>
      %173 = vector.shape_cast %172 : vector<2x8x32xf32> to vector<16x32xf32>
      %c0_81 = arith.constant 0 : index
      %c0_82 = arith.constant 0 : index
      %174 = vector.load %arg24[%c0_81, %c0_82] : memref<16x32xf32, #tpu.memory_space<vmem>>, vector<16x32xf32>
      tpu.vector_store %arg24[%c0_81, %c0_82], %173 {strides = array<i32>} : memref<16x32xf32, #tpu.memory_space<vmem>>, vector<16x32xf32>,
    } else {
    }
    %c0 = arith.constant 0 : index
    %c0_1 = arith.constant 0 : index
    %3 = vector.load %arg24[%c0, %c0_1] : memref<16x32xf32, #tpu.memory_space<vmem>>, vector<16x32xf32>
    %c0_2 = arith.constant 0 : index
    %c0_3 = arith.constant 0 : index
    %c0_4 = arith.constant 0 : index
    %4 = vector.load %arg3[%c0_2, %c0_3, %c0_4] : memref<2x1x8xf32, #tpu.memory_space<vmem>>, vector<2x1x8xf32>
    %5 = arith.truncf %3 : vector<16x32xf32> to vector<16x32xbf16>
    %c0_5 = arith.constant 0 : index
    %c0_6 = arith.constant 0 : index
    %c0_7 = arith.constant 0 : index
    %6 = vector.load %arg7[%c0_5, %c0_6, %c0_7] : memref<1x32x96xbf16, #tpu.memory_space<vmem>>, vector<1x32x96xbf16>
    %7 = vector.shape_cast %6 : vector<1x32x96xbf16> to vector<32x96xbf16>
    %cst = arith.constant dense<0.000000e+00> : vector<16x96xf32>
    %8 = tpu.matmul %5, %7, %cst {dimension_numbers = #tpu.dot_dimension_numbers<[1], [0], [0], [1], [0, 0, 1, 1], [], []>} : vector<16x32xbf16>, vector<32x96xbf16>, vector<16x96xf32> -> vector<16x96xf32>
    %c0_8 = arith.constant 0 : index
    %c0_9 = arith.constant 0 : index
    %c0_10 = arith.constant 0 : index
    %9 = vector.load %arg8[%c0_8, %c0_9, %c0_10] : memref<1x1x96xf32, #tpu.memory_space<vmem>>, vector<1x1x96xf32>
    %10 = vector.shape_cast %9 : vector<1x1x96xf32> to vector<1x96xf32>
    %11 = vector.broadcast %10 : vector<1x96xf32> to vector<16x96xf32>
    %12 = arith.addf %8, %11 : vector<16x96xf32>
    %13 = vector.shape_cast %12 : vector<16x96xf32> to vector<2x8x96xf32>
    %c0_11 = arith.constant 0 : index
    %c0_12 = arith.constant 0 : index
    %c0_13 = arith.constant 0 : index
    %14 = vector.load %arg9[%c0_11, %c0_12, %c0_13] : memref<1x32x32xbf16, #tpu.memory_space<vmem>>, vector<1x32x32xbf16>
    %15 = vector.shape_cast %14 : vector<1x32x32xbf16> to vector<32x32xbf16>
    %cst_14 = arith.constant 0.000000e+00 : f32
    %16 = vector.broadcast %cst_14 : f32 to vector<16x32xf32>
    %17 = vector.extract_strided_slice %13 {offsets = [0, 0, 0], sizes = [2, 8, 16], strides = [1, 1, 1]} : vector<2x8x96xf32> to vector<2x8x16xf32>
    %18 = arith.truncf %17 : vector<2x8x16xf32> to vector<2x8x16xbf16>
    %19 = vector.extract_strided_slice %13 {offsets = [0, 0, 32], sizes = [2, 8, 16], strides = [1, 1, 1]} : vector<2x8x96xf32> to vector<2x8x16xf32>
    %20 = arith.truncf %19 : vector<2x8x16xf32> to vector<2x8x16xbf16>
    %21 = vector.extract_strided_slice %13 {offsets = [0, 0, 64], sizes = [2, 8, 16], strides = [1, 1, 1]} : vector<2x8x96xf32> to vector<2x8x16xf32>
    %22 = arith.truncf %21 : vector<2x8x16xf32> to vector<2x8x16xbf16>
    "tpu.trace_start"() <{level = 10 : i32, message = "bqd,bkd->bqk"}> : () -> ()
    %cst_15 = arith.constant dense<0.000000e+00> : vector<2x8x8xf32>
    %23 = tpu.matmul %18, %20, %cst_15 {dimension_numbers = #tpu.dot_dimension_numbers<[2], [2], [1], [1], [0, 0, 0, 1, 1, 1], [0], [0]>} : vector<2x8x16xbf16>, vector<2x8x16xbf16>, vector<2x8x8xf32> -> vector<2x8x8xf32>
    "tpu.trace_stop"() : () -> ()
    %24 = vector.broadcast %4 : vector<2x1x8xf32> to vector<2x8x8xf32>
    %25 = arith.addf %23, %24 : vector<2x8x8xf32>
    %cst_16 = arith.constant dense<0xFF800000> : vector<2x8xf32>
    %26 = vector.multi_reduction <maximumf>, %25, %cst_16 [2] : vector<2x8x8xf32> to vector<2x8xf32>
    %27 = vector.shape_cast %26 : vector<2x8xf32> to vector<2x8x1xf32>
    %28 = vector.broadcast %27 : vector<2x8x1xf32> to vector<2x8x8xf32>
    %29 = arith.subf %25, %28 : vector<2x8x8xf32>
    %30 = math.exp %29 : vector<2x8x8xf32>
    %cst_17 = arith.constant dense<0.000000e+00> : vector<2x8xf32>
    %31 = vector.multi_reduction <add>, %30, %cst_17 [2] : vector<2x8x8xf32> to vector<2x8xf32>
    %32 = vector.shape_cast %31 : vector<2x8xf32> to vector<2x8x1xf32>
    %33 = tpu.reciprocal %32 {approx = true} : vector<2x8x1xf32> -> vector<2x8x1xf32>
    %34 = vector.broadcast %33 : vector<2x8x1xf32> to vector<2x8x8xf32>
    %35 = arith.mulf %30, %34 : vector<2x8x8xf32>
    %36 = arith.truncf %35 : vector<2x8x8xf32> to vector<2x8x8xbf16>
    "tpu.trace_start"() <{level = 10 : i32, message = "bqk,bkd->bqd"}> : () -> ()
    %cst_18 = arith.constant dense<0.000000e+00> : vector<2x8x16xf32>
    %37 = tpu.matmul %36, %22, %cst_18 {dimension_numbers = #tpu.dot_dimension_numbers<[2], [1], [1], [2], [0, 0, 0, 1, 1, 2], [0], [0]>} : vector<2x8x8xbf16>, vector<2x8x16xbf16>, vector<2x8x16xf32> -> vector<2x8x16xf32>
    "tpu.trace_stop"() : () -> ()
    %38 = vector.shape_cast %37 : vector<2x8x16xf32> to vector<16x16xf32>
    %39 = arith.truncf %38 : vector<16x16xf32> to vector<16x16xbf16>
    %40 = vector.extract_strided_slice %15 {offsets = [0, 0], sizes = [16, 32], strides = [1, 1]} : vector<32x32xbf16> to vector<16x32xbf16>
    %cst_19 = arith.constant dense<0.000000e+00> : vector<16x32xf32>
    %41 = tpu.matmul %39, %40, %cst_19 {dimension_numbers = #tpu.dot_dimension_numbers<[1], [0], [0], [1], [0, 0, 1, 1], [], []>} : vector<16x16xbf16>, vector<16x32xbf16>, vector<16x32xf32> -> vector<16x32xf32>
    %42 = arith.addf %16, %41 : vector<16x32xf32>
    %43 = vector.extract_strided_slice %13 {offsets = [0, 0, 16], sizes = [2, 8, 16], strides = [1, 1, 1]} : vector<2x8x96xf32> to vector<2x8x16xf32>
    %44 = arith.truncf %43 : vector<2x8x16xf32> to vector<2x8x16xbf16>
    %45 = vector.extract_strided_slice %13 {offsets = [0, 0, 48], sizes = [2, 8, 16], strides = [1, 1, 1]} : vector<2x8x96xf32> to vector<2x8x16xf32>
    %46 = arith.truncf %45 : vector<2x8x16xf32> to vector<2x8x16xbf16>
    %47 = vector.extract_strided_slice %13 {offsets = [0, 0, 80], sizes = [2, 8, 16], strides = [1, 1, 1]} : vector<2x8x96xf32> to vector<2x8x16xf32>
    %48 = arith.truncf %47 : vector<2x8x16xf32> to vector<2x8x16xbf16>
    "tpu.trace_start"() <{level = 10 : i32, message = "bqd,bkd->bqk"}> : () -> ()
    %cst_20 = arith.constant dense<0.000000e+00> : vector<2x8x8xf32>
    %49 = tpu.matmul %44, %46, %cst_20 {dimension_numbers = #tpu.dot_dimension_numbers<[2], [2], [1], [1], [0, 0, 0, 1, 1, 1], [0], [0]>} : vector<2x8x16xbf16>, vector<2x8x16xbf16>, vector<2x8x8xf32> -> vector<2x8x8xf32>
    "tpu.trace_stop"() : () -> ()
    %50 = vector.broadcast %4 : vector<2x1x8xf32> to vector<2x8x8xf32>
    %51 = arith.addf %49, %50 : vector<2x8x8xf32>
    %cst_21 = arith.constant dense<0xFF800000> : vector<2x8xf32>
    %52 = vector.multi_reduction <maximumf>, %51, %cst_21 [2] : vector<2x8x8xf32> to vector<2x8xf32>
    %53 = vector.shape_cast %52 : vector<2x8xf32> to vector<2x8x1xf32>
    %54 = vector.broadcast %53 : vector<2x8x1xf32> to vector<2x8x8xf32>
    %55 = arith.subf %51, %54 : vector<2x8x8xf32>
    %56 = math.exp %55 : vector<2x8x8xf32>
    %cst_22 = arith.constant dense<0.000000e+00> : vector<2x8xf32>
    %57 = vector.multi_reduction <add>, %56, %cst_22 [2] : vector<2x8x8xf32> to vector<2x8xf32>
    %58 = vector.shape_cast %57 : vector<2x8xf32> to vector<2x8x1xf32>
    %59 = tpu.reciprocal %58 {approx = true} : vector<2x8x1xf32> -> vector<2x8x1xf32>
    %60 = vector.broadcast %59 : vector<2x8x1xf32> to vector<2x8x8xf32>
    %61 = arith.mulf %56, %60 : vector<2x8x8xf32>
    %62 = arith.truncf %61 : vector<2x8x8xf32> to vector<2x8x8xbf16>
    "tpu.trace_start"() <{level = 10 : i32, message = "bqk,bkd->bqd"}> : () -> ()
    %cst_23 = arith.constant dense<0.000000e+00> : vector<2x8x16xf32>
    %63 = tpu.matmul %62, %48, %cst_23 {dimension_numbers = #tpu.dot_dimension_numbers<[2], [1], [1], [2], [0, 0, 0, 1, 1, 2], [0], [0]>} : vector<2x8x8xbf16>, vector<2x8x16xbf16>, vector<2x8x16xf32> -> vector<2x8x16xf32>
    "tpu.trace_stop"() : () -> ()
    %64 = vector.shape_cast %63 : vector<2x8x16xf32> to vector<16x16xf32>
    %65 = arith.truncf %64 : vector<16x16xf32> to vector<16x16xbf16>
    %66 = vector.extract_strided_slice %15 {offsets = [16, 0], sizes = [16, 32], strides = [1, 1]} : vector<32x32xbf16> to vector<16x32xbf16>
    %cst_24 = arith.constant dense<0.000000e+00> : vector<16x32xf32>
    %67 = tpu.matmul %65, %66, %cst_24 {dimension_numbers = #tpu.dot_dimension_numbers<[1], [0], [0], [1], [0, 0, 1, 1], [], []>} : vector<16x16xbf16>, vector<16x32xbf16>, vector<16x32xf32> -> vector<16x32xf32>
    %68 = arith.addf %42, %67 : vector<16x32xf32>
    %c0_25 = arith.constant 0 : index
    %c0_26 = arith.constant 0 : index
    %c0_27 = arith.constant 0 : index
    %69 = vector.load %arg10[%c0_25, %c0_26, %c0_27] : memref<1x1x32xf32, #tpu.memory_space<vmem>>, vector<1x1x32xf32>
    %70 = vector.shape_cast %69 : vector<1x1x32xf32> to vector<1x32xf32>
    %71 = vector.broadcast %70 : vector<1x32xf32> to vector<16x32xf32>
    %72 = arith.addf %68, %71 : vector<16x32xf32>
    %73 = arith.addf %3, %72 : vector<16x32xf32>
    %c0_28 = arith.constant 0 : index
    %c0_29 = arith.constant 0 : index
    %c0_30 = arith.constant 0 : index
    %74 = vector.load %arg11[%c0_28, %c0_29, %c0_30] : memref<1x1x32xf32, #tpu.memory_space<vmem>>, vector<1x1x32xf32>
    %75 = vector.shape_cast %74 : vector<1x1x32xf32> to vector<1x32xf32>
    %c0_31 = arith.constant 0 : index
    %c0_32 = arith.constant 0 : index
    %c0_33 = arith.constant 0 : index
    %76 = vector.load %arg12[%c0_31, %c0_32, %c0_33] : memref<1x1x32xf32, #tpu.memory_space<vmem>>, vector<1x1x32xf32>
    %77 = vector.shape_cast %76 : vector<1x1x32xf32> to vector<1x32xf32>
    %cst_34 = arith.constant dense<0.000000e+00> : vector<16xf32>
    %78 = vector.multi_reduction <add>, %73, %cst_34 [1] : vector<16x32xf32> to vector<16xf32>
    %79 = vector.shape_cast %78 : vector<16xf32> to vector<16x1xf32>
    %cst_35 = arith.constant 3.200000e+01 : f32
    %80 = vector.broadcast %cst_35 : f32 to vector<16x1xf32>
    %81 = arith.divf %79, %80 : vector<16x1xf32>
    %82 = vector.broadcast %81 : vector<16x1xf32> to vector<16x32xf32>
    %83 = arith.subf %73, %82 : vector<16x32xf32>
    %84 = arith.mulf %83, %83 : vector<16x32xf32>
    %cst_36 = arith.constant dense<0.000000e+00> : vector<16xf32>
    %85 = vector.multi_reduction <add>, %84, %cst_36 [1] : vector<16x32xf32> to vector<16xf32>
    %86 = vector.shape_cast %85 : vector<16xf32> to vector<16x1xf32>
    %cst_37 = arith.constant 3.200000e+01 : f32
    %87 = vector.broadcast %cst_37 : f32 to vector<16x1xf32>
    %88 = arith.divf %86, %87 : vector<16x1xf32>
    %89 = vector.broadcast %81 : vector<16x1xf32> to vector<16x32xf32>
    %90 = arith.subf %73, %89 : vector<16x32xf32>
    %cst_38 = arith.constant 9.99999974E-6 : f32
    %91 = vector.broadcast %cst_38 : f32 to vector<16x1xf32>
    %92 = arith.addf %88, %91 : vector<16x1xf32>
    %93 = math.rsqrt %92 : vector<16x1xf32>
    %94 = vector.broadcast %93 : vector<16x1xf32> to vector<16x32xf32>
    %95 = arith.mulf %90, %94 : vector<16x32xf32>
    %96 = vector.broadcast %75 : vector<1x32xf32> to vector<16x32xf32>
    %97 = arith.mulf %95, %96 : vector<16x32xf32>
    %98 = vector.broadcast %77 : vector<1x32xf32> to vector<16x32xf32>
    %99 = arith.addf %97, %98 : vector<16x32xf32>
    %100 = arith.truncf %99 : vector<16x32xf32> to vector<16x32xbf16>
    %c0_39 = arith.constant 0 : index
    %c0_40 = arith.constant 0 : index
    %c0_41 = arith.constant 0 : index
    %101 = vector.load %arg13[%c0_39, %c0_40, %c0_41] : memref<1x32x64xbf16, #tpu.memory_space<vmem>>, vector<1x32x64xbf16>
    %102 = vector.shape_cast %101 : vector<1x32x64xbf16> to vector<32x64xbf16>
    %cst_42 = arith.constant dense<0.000000e+00> : vector<16x64xf32>
    %103 = tpu.matmul %100, %102, %cst_42 {dimension_numbers = #tpu.dot_dimension_numbers<[1], [0], [0], [1], [0, 0, 1, 1], [], []>} : vector<16x32xbf16>, vector<32x64xbf16>, vector<16x64xf32> -> vector<16x64xf32>
    %c0_43 = arith.constant 0 : index
    %c0_44 = arith.constant 0 : index
    %c0_45 = arith.constant 0 : index
    %104 = vector.load %arg14[%c0_43, %c0_44, %c0_45] : memref<1x1x64xf32, #tpu.memory_space<vmem>>, vector<1x1x64xf32>
    %105 = vector.shape_cast %104 : vector<1x1x64xf32> to vector<1x64xf32>
    %106 = vector.broadcast %105 : vector<1x64xf32> to vector<16x64xf32>
    %107 = arith.addf %103, %106 : vector<16x64xf32>
    %cst_46 = arith.constant 5.000000e-01 : f32
    %108 = vector.broadcast %cst_46 : f32 to vector<16x64xf32>
    %109 = arith.mulf %108, %107 : vector<16x64xf32>
    %cst_47 = arith.constant 4.471500e-02 : f32
    %110 = vector.broadcast %cst_47 : f32 to vector<16x64xf32>
    %111 = arith.mulf %110, %107 : vector<16x64xf32>
    %112 = arith.mulf %111, %107 : vector<16x64xf32>
    %113 = arith.mulf %112, %107 : vector<16x64xf32>
    %114 = arith.addf %107, %113 : vector<16x64xf32>
    %cst_48 = arith.constant 0.797884583 : f32
    %115 = vector.broadcast %cst_48 : f32 to vector<16x64xf32>
    %116 = arith.mulf %115, %114 : vector<16x64xf32>
    %117 = math.tanh %116 : vector<16x64xf32>
    %cst_49 = arith.constant 1.000000e+00 : f32
    %118 = vector.broadcast %cst_49 : f32 to vector<16x64xf32>
    %119 = arith.addf %118, %117 : vector<16x64xf32>
    %120 = arith.mulf %109, %119 : vector<16x64xf32>
    %121 = arith.truncf %120 : vector<16x64xf32> to vector<16x64xbf16>
    %c0_50 = arith.constant 0 : index
    %c0_51 = arith.constant 0 : index
    %c0_52 = arith.constant 0 : index
    %122 = vector.load %arg15[%c0_50, %c0_51, %c0_52] : memref<1x64x32xbf16, #tpu.memory_space<vmem>>, vector<1x64x32xbf16>
    %123 = vector.shape_cast %122 : vector<1x64x32xbf16> to vector<64x32xbf16>
    %cst_53 = arith.constant dense<0.000000e+00> : vector<16x32xf32>
    %124 = tpu.matmul %121, %123, %cst_53 {dimension_numbers = #tpu.dot_dimension_numbers<[1], [0], [0], [1], [0, 0, 1, 1], [], []>} : vector<16x64xbf16>, vector<64x32xbf16>, vector<16x32xf32> -> vector<16x32xf32>
    %c0_54 = arith.constant 0 : index
    %c0_55 = arith.constant 0 : index
    %c0_56 = arith.constant 0 : index
    %125 = vector.load %arg16[%c0_54, %c0_55, %c0_56] : memref<1x1x32xf32, #tpu.memory_space<vmem>>, vector<1x1x32xf32>
    %126 = vector.shape_cast %125 : vector<1x1x32xf32> to vector<1x32xf32>
    %127 = vector.broadcast %126 : vector<1x32xf32> to vector<16x32xf32>
    %128 = arith.addf %124, %127 : vector<16x32xf32>
    %129 = arith.addf %99, %128 : vector<16x32xf32>
    %c0_57 = arith.constant 0 : index
    %c0_58 = arith.constant 0 : index
    %c0_59 = arith.constant 0 : index
    %130 = vector.load %arg17[%c0_57, %c0_58, %c0_59] : memref<1x1x32xf32, #tpu.memory_space<vmem>>, vector<1x1x32xf32>
    %131 = vector.shape_cast %130 : vector<1x1x32xf32> to vector<1x32xf32>
    %c0_60 = arith.constant 0 : index
    %c0_61 = arith.constant 0 : index
    %c0_62 = arith.constant 0 : index
    %132 = vector.load %arg18[%c0_60, %c0_61, %c0_62] : memref<1x1x32xf32, #tpu.memory_space<vmem>>, vector<1x1x32xf32>
    %133 = vector.shape_cast %132 : vector<1x1x32xf32> to vector<1x32xf32>
    %cst_63 = arith.constant dense<0.000000e+00> : vector<16xf32>
    %134 = vector.multi_reduction <add>, %129, %cst_63 [1] : vector<16x32xf32> to vector<16xf32>
    %135 = vector.shape_cast %134 : vector<16xf32> to vector<16x1xf32>
    %cst_64 = arith.constant 3.200000e+01 : f32
    %136 = vector.broadcast %cst_64 : f32 to vector<16x1xf32>
    %137 = arith.divf %135, %136 : vector<16x1xf32>
    %138 = vector.broadcast %137 : vector<16x1xf32> to vector<16x32xf32>
    %139 = arith.subf %129, %138 : vector<16x32xf32>
    %140 = arith.mulf %139, %139 : vector<16x32xf32>
    %cst_65 = arith.constant dense<0.000000e+00> : vector<16xf32>
    %141 = vector.multi_reduction <add>, %140, %cst_65 [1] : vector<16x32xf32> to vector<16xf32>
    %142 = vector.shape_cast %141 : vector<16xf32> to vector<16x1xf32>
    %cst_66 = arith.constant 3.200000e+01 : f32
    %143 = vector.broadcast %cst_66 : f32 to vector<16x1xf32>
    %144 = arith.divf %142, %143 : vector<16x1xf32>
    %145 = vector.broadcast %137 : vector<16x1xf32> to vector<16x32xf32>
    %146 = arith.subf %129, %145 : vector<16x32xf32>
    %cst_67 = arith.constant 9.99999974E-6 : f32
    %147 = vector.broadcast %cst_67 : f32 to vector<16x1xf32>
    %148 = arith.addf %144, %147 : vector<16x1xf32>
    %149 = math.rsqrt %148 : vector<16x1xf32>
    %150 = vector.broadcast %149 : vector<16x1xf32> to vector<16x32xf32>
    %151 = arith.mulf %146, %150 : vector<16x32xf32>
    %152 = vector.broadcast %131 : vector<1x32xf32> to vector<16x32xf32>
    %153 = arith.mulf %151, %152 : vector<16x32xf32>
    %154 = vector.broadcast %133 : vector<1x32xf32> to vector<16x32xf32>
    %155 = arith.addf %153, %154 : vector<16x32xf32>
    %c0_68 = arith.constant 0 : index
    %c0_69 = arith.constant 0 : index
    %156 = vector.load %arg24[%c0_68, %c0_69] : memref<16x32xf32, #tpu.memory_space<vmem>>, vector<16x32xf32>
    tpu.vector_store %arg24[%c0_68, %c0_69], %155 {strides = array<i32>} : memref<16x32xf32, #tpu.memory_space<vmem>>, vector<16x32xf32>,
    %c1_i32 = arith.constant 1 : i32
    %157 = arith.cmpi eq, %arg1, %c1_i32 : i32
    %158 = arith.extui %157 : i1 to i32
    %c0_i32_70 = arith.constant 0 : i32
    %159 = arith.cmpi ne, %158, %c0_i32_70 : i32
    scf.if %159 {
      %160 = vector.shape_cast %155 : vector<16x32xf32> to vector<2x8x32xf32>
      %cst_71 = arith.constant dense<0.000000e+00> : vector<2x32xf32>
      %161 = vector.multi_reduction <add>, %160, %cst_71 [1] : vector<2x8x32xf32> to vector<2x32xf32>
      %cst_72 = arith.constant 8.000000e+00 : f32
      %162 = vector.broadcast %cst_72 : f32 to vector<2x32xf32>
      %163 = arith.divf %161, %162 : vector<2x32xf32>
      %164 = arith.truncf %163 : vector<2x32xf32> to vector<2x32xbf16>
      %c0_73 = arith.constant 0 : index
      %c0_74 = arith.constant 0 : index
      %165 = vector.load %arg19[%c0_73, %c0_74] : memref<32x32xbf16, #tpu.memory_space<vmem>>, vector<32x32xbf16>
      %cst_75 = arith.constant dense<0.000000e+00> : vector<2x32xf32>
      %166 = tpu.matmul %164, %165, %cst_75 {dimension_numbers = #tpu.dot_dimension_numbers<[1], [0], [0], [1], [0, 0, 1, 1], [], []>} : vector<2x32xbf16>, vector<32x32xbf16>, vector<2x32xf32> -> vector<2x32xf32>
      %c0_76 = arith.constant 0 : index
      %c0_77 = arith.constant 0 : index
      %167 = vector.load %arg20[%c0_76, %c0_77] : memref<1x32xf32, #tpu.memory_space<vmem>>, vector<1x32xf32>
      %168 = vector.broadcast %167 : vector<1x32xf32> to vector<2x32xf32>
      %169 = arith.addf %166, %168 : vector<2x32xf32>
      %c0_78 = arith.constant 0 : index
      %c0_79 = arith.constant 0 : index
      %170 = vector.load %arg21[%c0_78, %c0_79] : memref<32x32xbf16, #tpu.memory_space<vmem>>, vector<32x32xbf16>
      %cst_80 = arith.constant dense<0.000000e+00> : vector<2x32xf32>
      %171 = tpu.matmul %164, %170, %cst_80 {dimension_numbers = #tpu.dot_dimension_numbers<[1], [0], [0], [1], [0, 0, 1, 1], [], []>} : vector<2x32xbf16>, vector<32x32xbf16>, vector<2x32xf32> -> vector<2x32xf32>
      %c0_81 = arith.constant 0 : index
      %c0_82 = arith.constant 0 : index
      %172 = vector.load %arg22[%c0_81, %c0_82] : memref<1x32xf32, #tpu.memory_space<vmem>>, vector<1x32xf32>
      %173 = vector.broadcast %172 : vector<1x32xf32> to vector<2x32xf32>
      %174 = arith.addf %171, %173 : vector<2x32xf32>
      %cst_83 = arith.constant dense<0xFF800000> : vector<2xf32>
      %175 = vector.multi_reduction <maximumf>, %174, %cst_83 [1] : vector<2x32xf32> to vector<2xf32>
      %176 = vector.shape_cast %175 : vector<2xf32> to vector<2x1xf32>
      %177 = vector.broadcast %176 : vector<2x1xf32> to vector<2x32xf32>
      %178 = arith.subf %174, %177 : vector<2x32xf32>
      %179 = math.exp %178 : vector<2x32xf32>
      %cst_84 = arith.constant dense<0.000000e+00> : vector<2xf32>
      %180 = vector.multi_reduction <add>, %179, %cst_84 [1] : vector<2x32xf32> to vector<2xf32>
      %181 = vector.shape_cast %180 : vector<2xf32> to vector<2x1xf32>
      %182 = vector.broadcast %181 : vector<2x1xf32> to vector<2x32xf32>
      %183 = arith.divf %179, %182 : vector<2x32xf32>
      %cst_85 = arith.constant 9.99999997E-7 : f32
      %184 = vector.broadcast %cst_85 : f32 to vector<2x32xf32>
      %185 = arith.addf %183, %184 : vector<2x32xf32>
      %186 = vector.shape_cast %169 : vector<2x32xf32> to vector<2x1x32xf32>
      %c0_86 = arith.constant 0 : index
      %c0_87 = arith.constant 0 : index
      %c0_88 = arith.constant 0 : index
      %187 = vector.load %arg23[%c0_86, %c0_87, %c0_88] : memref<2x1x64xf32, #tpu.memory_space<vmem>>, vector<2x1x32xf32>
      tpu.vector_store %arg23[%c0_86, %c0_87, %c0_88], %186 {strides = array<i32>} : memref<2x1x64xf32, #tpu.memory_space<vmem>>, vector<2x1x32xf32>,
      %188 = vector.shape_cast %185 : vector<2x32xf32> to vector<2x1x32xf32>
      %c0_89 = arith.constant 0 : index
      %c0_90 = arith.constant 0 : index
      %c32 = arith.constant 32 : index
      %189 = vector.load %arg23[%c0_89, %c0_90, %c32] : memref<2x1x64xf32, #tpu.memory_space<vmem>>, vector<2x1x32xf32>
      tpu.vector_store %arg23[%c0_89, %c0_90, %c32], %188 {strides = array<i32>} : memref<2x1x64xf32, #tpu.memory_space<vmem>>, vector<2x1x32xf32>,
    } else {
    }
    return
  }
  func.func @transform_0(%arg0: i32, %arg1: i32) -> (i32, i32, i32) {
    %c0_i32 = arith.constant 0 : i32
    %c0_i32_0 = arith.constant 0 : i32
    %c0_i32_1 = arith.constant 0 : i32
    return %arg0, %c0_i32, %c0_i32_0 : i32, i32, i32
  }
  func.func @transform_1(%arg0: i32, %arg1: i32) -> (i32, i32, i32) {
    %c0_i32 = arith.constant 0 : i32
    %c0_i32_0 = arith.constant 0 : i32
    %c0_i32_1 = arith.constant 0 : i32
    return %arg0, %c0_i32, %c0_i32_0 : i32, i32, i32
  }
  func.func @transform_2(%arg0: i32, %arg1: i32) -> (i32, i32) {
    %c0_i32 = arith.constant 0 : i32
    %c0_i32_0 = arith.constant 0 : i32
    %c0_i32_1 = arith.constant 0 : i32
    return %c0_i32, %c0_i32_0 : i32, i32
  }
  func.func @transform_3(%arg0: i32, %arg1: i32) -> (i32, i32) {
    %c0_i32 = arith.constant 0 : i32
    %c0_i32_0 = arith.constant 0 : i32
    %c0_i32_1 = arith.constant 0 : i32
    return %c0_i32, %c0_i32_0 : i32, i32
  }
  func.func @transform_4(%arg0: i32, %arg1: i32) -> (i32, i32) {
    %c0_i32 = arith.constant 0 : i32
    %c0_i32_0 = arith.constant 0 : i32
    %c0_i32_1 = arith.constant 0 : i32
    return %c0_i32, %c0_i32_0 : i32, i32
  }
  func.func @transform_5(%arg0: i32, %arg1: i32) -> (i32, i32, i32) {
    %c0_i32 = arith.constant 0 : i32
    %c0_i32_0 = arith.constant 0 : i32
    %c0_i32_1 = arith.constant 0 : i32
    return %arg1, %c0_i32, %c0_i32_0 : i32, i32, i32
  }
  func.func @transform_6(%arg0: i32, %arg1: i32) -> (i32, i32, i32) {
    %c0_i32 = arith.constant 0 : i32
    %c0_i32_0 = arith.constant 0 : i32
    %c0_i32_1 = arith.constant 0 : i32
    return %arg1, %c0_i32, %c0_i32_0 : i32, i32, i32
  }
  func.func @transform_7(%arg0: i32, %arg1: i32) -> (i32, i32, i32) {
    %c0_i32 = arith.constant 0 : i32
    %c0_i32_0 = arith.constant 0 : i32
    %c0_i32_1 = arith.constant 0 : i32
    return %arg1, %c0_i32, %c0_i32_0 : i32, i32, i32
  }
  func.func @transform_8(%arg0: i32, %arg1: i32) -> (i32, i32, i32) {
    %c0_i32 = arith.constant 0 : i32
    %c0_i32_0 = arith.constant 0 : i32
    %c0_i32_1 = arith.constant 0 : i32
    return %arg1, %c0_i32, %c0_i32_0 : i32, i32, i32
  }
  func.func @transform_9(%arg0: i32, %arg1: i32) -> (i32, i32, i32) {
    %c0_i32 = arith.constant 0 : i32
    %c0_i32_0 = arith.constant 0 : i32
    %c0_i32_1 = arith.constant 0 : i32
    return %arg1, %c0_i32, %c0_i32_0 : i32, i32, i32
  }
  func.func @transform_10(%arg0: i32, %arg1: i32) -> (i32, i32, i32) {
    %c0_i32 = arith.constant 0 : i32
    %c0_i32_0 = arith.constant 0 : i32
    %c0_i32_1 = arith.constant 0 : i32
    return %arg1, %c0_i32, %c0_i32_0 : i32, i32, i32
  }
  func.func @transform_11(%arg0: i32, %arg1: i32) -> (i32, i32, i32) {
    %c0_i32 = arith.constant 0 : i32
    %c0_i32_0 = arith.constant 0 : i32
    %c0_i32_1 = arith.constant 0 : i32
    return %arg1, %c0_i32, %c0_i32_0 : i32, i32, i32
  }
  func.func @transform_12(%arg0: i32, %arg1: i32) -> (i32, i32, i32) {
    %c0_i32 = arith.constant 0 : i32
    %c0_i32_0 = arith.constant 0 : i32
    %c0_i32_1 = arith.constant 0 : i32
    return %arg1, %c0_i32, %c0_i32_0 : i32, i32, i32
  }
  func.func @transform_13(%arg0: i32, %arg1: i32) -> (i32, i32, i32) {
    %c0_i32 = arith.constant 0 : i32
    %c0_i32_0 = arith.constant 0 : i32
    %c0_i32_1 = arith.constant 0 : i32
    return %arg1, %c0_i32, %c0_i32_0 : i32, i32, i32
  }
  func.func @transform_14(%arg0: i32, %arg1: i32) -> (i32, i32, i32) {
    %c0_i32 = arith.constant 0 : i32
    %c0_i32_0 = arith.constant 0 : i32
    %c0_i32_1 = arith.constant 0 : i32
    return %arg1, %c0_i32, %c0_i32_0 : i32, i32, i32
  }
  func.func @transform_15(%arg0: i32, %arg1: i32) -> (i32, i32, i32) {
    %c0_i32 = arith.constant 0 : i32
    %c0_i32_0 = arith.constant 0 : i32
    %c0_i32_1 = arith.constant 0 : i32
    return %arg1, %c0_i32, %c0_i32_0 : i32, i32, i32
  }
  func.func @transform_16(%arg0: i32, %arg1: i32) -> (i32, i32, i32) {
    %c0_i32 = arith.constant 0 : i32
    %c0_i32_0 = arith.constant 0 : i32
    %c0_i32_1 = arith.constant 0 : i32
    return %arg1, %c0_i32, %c0_i32_0 : i32, i32, i32
  }
  func.func @transform_17(%arg0: i32, %arg1: i32) -> (i32, i32) {
    %c0_i32 = arith.constant 0 : i32
    %c0_i32_0 = arith.constant 0 : i32
    %c0_i32_1 = arith.constant 0 : i32
    return %c0_i32, %c0_i32_0 : i32, i32
  }
  func.func @transform_18(%arg0: i32, %arg1: i32) -> (i32, i32) {
    %c0_i32 = arith.constant 0 : i32
    %c0_i32_0 = arith.constant 0 : i32
    %c0_i32_1 = arith.constant 0 : i32
    return %c0_i32, %c0_i32_0 : i32, i32
  }
  func.func @transform_19(%arg0: i32, %arg1: i32) -> (i32, i32) {
    %c0_i32 = arith.constant 0 : i32
    %c0_i32_0 = arith.constant 0 : i32
    %c0_i32_1 = arith.constant 0 : i32
    return %c0_i32, %c0_i32_0 : i32, i32
  }
  func.func @transform_20(%arg0: i32, %arg1: i32) -> (i32, i32) {
    %c0_i32 = arith.constant 0 : i32
    %c0_i32_0 = arith.constant 0 : i32
    %c0_i32_1 = arith.constant 0 : i32
    return %c0_i32, %c0_i32_0 : i32, i32
  }
  func.func @transform_21(%arg0: i32, %arg1: i32) -> (i32, i32, i32) {
    %c0_i32 = arith.constant 0 : i32
    %c0_i32_0 = arith.constant 0 : i32
    %c0_i32_1 = arith.constant 0 : i32
    return %arg0, %c0_i32, %c0_i32_0 : i32, i32, i32
  }
}

</mosaic_0001>

<bundles_post_ra>
// kernel: tpu_custom_call.1
= control target key start
LH: loop header
LB: loop body
LE: loop exit
PB: predicated region body
PF: predicated region fallthrough
CT: control target
= control target key end

     0   :  { %s3516_s0 = inlined_call_operand.hbm [shape: f32[2,8,12], index: 0, kind: input, shape index: {}]   ;;  %s3517_s1 = inlined_call_operand.hbm [shape: f32[2,1,8], index: 1, kind: input, shape index: {}]   ;;  %s3518_s2 = inlined_call_operand.hbm [shape: f32[8,32], index: 2, kind: input, shape index: {}]   ;;  %s3519_s3 = inlined_call_operand.hbm [shape: bf16[12,32], index: 3, kind: input, shape index: {}]   ;;  %s3520_s4 = inlined_call_operand.vmem [shape: f32[1,32], index: 4, kind: input, shape index: {}]   ;;  %s3521_s5 = inlined_call_operand.vmem [shape: bf16[2,32,96], index: 5, kind: input, shape index: {}]   ;;  %s3522_s6 = inlined_call_operand.hbm [shape: f32[2,1,96], index: 6, kind: input, shape index: {}]   ;;  %s3523_s7 = inlined_call_operand.vmem [shape: bf16[2,32,32], index: 7, kind: input, shape index: {}]   ;;  %s3524_s8 = inlined_call_operand.hbm [shape: f32[2,1,32], index: 8, kind: input, shape index: {}]   ;;  %s3525_s9 = inlined_call_operand.hbm [shape: f32[2,1,32], index: 9, kind: input, shape index: {}]   ;;  %s3526_s10 = inlined_call_operand.hbm [shape: f32[2,1,32], index: 10, kind: input, shape index: {}]   ;;  %s3527_s11 = inlined_call_operand.vmem [shape: bf16[2,32,64], index: 11, kind: input, shape index: {}]   ;;  %s3528_s12 = inlined_call_operand.hbm [shape: f32[2,1,64], index: 12, kind: input, shape index: {}]   ;;  %s3529_s13 = inlined_call_operand.vmem [shape: bf16[2,64,32], index: 13, kind: input, shape index: {}]   ;;  %s3530_s14 = inlined_call_operand.hbm [shape: f32[2,1,32], index: 14, kind: input, shape index: {}]   ;;  %s3531_s15 = inlined_call_operand.hbm [shape: f32[2,1,32], index: 15, kind: input, shape index: {}]   ;;  %s3532_s16 = inlined_call_operand.hbm [shape: f32[2,1,32], index: 16, kind: input, shape index: {}]   ;;  %s3533_s17 = inlined_call_operand.hbm [shape: bf16[32,32], index: 17, kind: input, shape index: {}]   ;;  %s3534_s18 = inlined_call_operand.hbm [shape: f32[1,32], index: 18, kind: input, shape index: {}]   ;;  %s3535_s19 = inlined_call_operand.vmem [shape: bf16[32,32], index: 19, kind: input, shape index: {}]   ;;  %s3536_s20 = inlined_call_operand.vmem [shape: f32[1,32], index: 20, kind: input, shape index: {}]   ;;  %s3537_s21 = inlined_call_operand.hbm [shape: f32[2,1,64], index: 21, kind: output, shape index: {}]  }
   0x1   :  { %3542 = sst [smem:[#allocation32_spill]] %s3516_s0 }
   0x2   :  { %3543 = sst [smem:[#allocation33_spill]] %s3517_s1 }
   0x3   :  { %3544 = sst [smem:[#allocation34_spill]] %s3518_s2 }
   0x4   :  { %3545 = sst [smem:[#allocation35_spill]] %s3519_s3 }
   0x5   :  { %3546 = sst [smem:[#allocation36_spill]] %s3520_s4 }
   0x6   :  { %3547 = sst [smem:[#allocation37_spill]] %s3521_s5 }
   0x7   :  { %3548 = sst [smem:[#allocation38_spill]] %s3522_s6 }
   0x8   :  { %3549 = sst [smem:[#allocation39_spill]] %s3523_s7 }
   0x9   :  { %3550 = sst [smem:[#allocation40_spill]] %s3524_s8 }
   0xa   :  { %3551 = sst [smem:[#allocation41_spill]] %s3525_s9 }
   0xb   :  { %3552 = sst [smem:[#allocation42_spill]] %s3526_s10 }
   0xc   :  { %3553 = sst [smem:[#allocation43_spill]] %s3527_s11 }
   0xd   :  { %3554 = sst [smem:[#allocation44_spill]] %s3528_s12 }
   0xe   :  { %3555 = sst [smem:[#allocation45_spill]] %s3529_s13 }
   0xf   :  { %3556 = sst [smem:[#allocation46_spill]] %s3535_s19 }
  0x10   :  { %3557 = sst [smem:[#allocation47_spill]] %s3536_s20 }
  0x11   :  { %3558 = sst [smem:[#allocation48_spill]] %s3537_s21 }
  0x12   :  { %26 = vsyncpa [#allocation4], 0 }
  0x13   :  { %27 = vsyncpa [#allocation7], 0 }
  0x14   :  { %28 = vsyncpa [#allocation10], 0 }
  0x15   :  { %29 = vsyncpa [#allocation5], 0  ;;  %s3155_s2 = smov 0   ;;  %s3157_s25 = smov 0  }
  0x16   :  { %s3159_s26 = smov 0   ;;  %s3161_s27 = smov 0  }
  0x17   :  { %s3163_s3 = smov 0   ;;  %s3165_s28 = smov 0  }
  0x18 LB: > { %3559 = sst [smem:[#allocation29_spill]] %s3012_s27  ;;  %s3184_s29 = sadd.s32 4294967295, %s3020_s28   ;;  %s3020_s28 = sphi %s3165_s28, %s35_s28   ;;  %s3016_s3 = sphi %s3163_s3, %s3600_s3   ;;  %s3012_s27 = sphi %s3161_s27, %s3599_s27   ;;  %s3008_s26 = sphi %s3159_s26, %s3598_s26   ;;  %s3004_s25 = sphi %s3157_s25, %s3597_s25   ;;  %s3000_s2 = sphi %s3155_s2, %s3596_s2  }
  0x19   : > { %3560 = sst [smem:[#allocation30_spill]] %s3020_s28  ;;  %p208_p0 = scmp.ne.s32.totalorder %s3004_s25, %s3000_s2 }
  0x1a   : > { %p209_p1 = scmp.eq.s32.totalorder %s3184_s29, 0  ;;  %p2151_p2 = scmp.ge.s32.totalorder %s3020_s28, 1 }
  0x1b   : > { %p589_p3 = scmp.lt.s32.totalorder %s3020_s28, 3  ;;  %s3562_s5 = sld [smem:[#allocation32_spill]] }
  0x1c   : > { %p3192_p4 = por %p209_p1, %p208_p0  ;;  %s3022_s1 = smov [#allocation3]  }
  0x1d   : > { %p3199_p5 = pnand %p2151_p2, %p589_p3  ;;  %s605_s24 = sshll.u32 %s3022_s1, 4  ;;  %s606_s24 = int_to_ptr.vmem [resolvable:$true] %s605_s24 }
  0x1e   : > { %s3023_s4 = smov 128   ;;  %s3024_s30 = smov 8  }
  0x1f   : > { %p2319_p6 = pneg %p3199_p5  ;;  %s195_s21 = sadd.s32 1, %s3008_s26 }
  0x20   : > { %p202_p9 = scmp.ne.s32.totalorder %s3008_s26, %s3004_s25  ;;  %p203_p10 = scmp.eq.s32.totalorder %s3020_s28, 0 }
  0x21   : > { %s603_s22 = sshll.u32 %s3562_s5, 4  ;;  %p3207_p7 = pnand %p2319_p6, %p209_p1  ;;  %s604_s22 = int_to_ptr.hbm [resolvable:$true] %s603_s22 }
  0x22   : > { %s44_s5 = sadd.s32 1, %s3016_s3  ;;  %p3220_p11 = por %p203_p10, %p202_p9 }
  0x23   : > { %2322 = dma.hbm_to_vmem [thread:$0]  (!%p3207_p7), %s604_s22, 256, %s606_s24, [#allocation4], %s3023_s4, %s3023_s4, %s3024_s30  }
  0x24   : > { %p45_p8 = scmp.ge.s32.totalorder %s44_s5, 2  ;;  %p2369_p12 = scmp.lt.s32.totalorder %s3020_s28, 2 }
  0x25   : > { %s704_s19 = sand.u32 1, %s3020_s28   ;;  %s3229_s13 = sand.u32 1, %s3008_s26  }
  0x26   : > { %s3602_s5 = smov (%p45_p8, %s44_s5), 0  ;;  %s3567_s6 = sld [smem:[#allocation38_spill]] }
  0x27   : > { %3565 = sst [smem:[#allocation31_spill]] %s3602_s5  ;;  %s192_s20 = ssub.s32 %s3016_s3, %s3602_s5 }
  0x28   : > { %p193_p13 = scmp.eq.s32.totalorder %s192_s20, 0  ;;  %s707_s7 = scalar_lea.vmem [#allocation11], %s3229_s13 }
  0x29   : > { %s714_s27 = sshll.u32 %s707_s7, 4  ;;  %p3241_p0 = pnand %p2369_p12, %p3220_p11  ;;  %s715_s27 = int_to_ptr.vmem [resolvable:$true] %s714_s27 }
  0x2a   : > { %s3236_s30 = scalar_select %p193_p13, %s3008_s26, %s195_s21  }
  0x2b   : > { %s3569_s8 = sld [smem:[#allocation40_spill]]  ;;  %s3249_s24 = scalar_lea.sflag [#allocation4], %s704_s19 }
  0x2c   : > { %s710_s4 = scalar_lea.hbm %s3567_s6, %s3016_s3  ;;  %s732_s7 = scalar_lea.vmem [#allocation12], %s3229_s13 }
  0x2d   : > { %s712_s11 = sshll.u32 %s710_s4, 4  ;;  %s739_s1 = sshll.u32 %s732_s7, 4  ;;  %s713_s11 = int_to_ptr.hbm [resolvable:$true] %s712_s11  ;;  %s740_s1 = int_to_ptr.vmem [resolvable:$true] %s739_s1 }
  0x2e   : > { %2341 = dma.hbm_to_vmem [thread:$0]  (!%p3241_p0), %s713_s11, 16, %s715_s27, %s3249_s24  }
  0x2f   : > { %s3570_s9 = sld [smem:[#allocation41_spill]]  ;;  %s749_s4 = scalar_lea.vmem [#allocation13], %s3229_s13 }
  0x30   : > { %s3571_s10 = sld [smem:[#allocation42_spill]]  ;;  %s3026_s28 = smov 16  }
  0x31   : > { %s735_s21 = scalar_lea.hbm %s3569_s8, %s3016_s3  ;;  %s766_s8 = scalar_lea.vmem [#allocation14], %s3229_s13 }
  0x32   : > { %s737_s22 = sshll.u32 %s735_s21, 4  ;;  %s756_s21 = sshll.u32 %s749_s4, 4  ;;  %s738_s22 = int_to_ptr.hbm [resolvable:$true] %s737_s22  ;;  %s757_s21 = int_to_ptr.vmem [resolvable:$true] %s756_s21 }
  0x33   : > { %2344 = dma.hbm_to_vmem [thread:$0]  (!%p3241_p0), %s738_s22, 16, %s740_s1, %s3249_s24  }
  0x34   : > { %s773_s22 = sshll.u32 %s766_s8, 4  ;;  %s3572_s12 = sld [smem:[#allocation44_spill]]  ;;  %s774_s22 = int_to_ptr.vmem [resolvable:$true] %s773_s22 }
  0x35   : > { %s752_s19 = scalar_lea.hbm %s3570_s9, %s3016_s3  ;;  %s791_s4 = scalar_lea.vmem [#allocation15], %s3229_s13 }
  0x36   : > { %s754_s6 = sshll.u32 %s752_s19, 4  ;;  %s769_s7 = scalar_lea.hbm %s3571_s10, %s3016_s3  ;;  %s755_s6 = int_to_ptr.hbm [resolvable:$true] %s754_s6 }
  0x37   : > { %2347 = dma.hbm_to_vmem [thread:$0]  (!%p3241_p0), %s755_s6, 16, %s757_s21, %s3249_s24  }
  0x38   : > { %s771_s1 = sshll.u32 %s769_s7, 4  ;;  %s798_s6 = sshll.u32 %s791_s4, 4  ;;  %s772_s1 = int_to_ptr.hbm [resolvable:$true] %s771_s1  ;;  %s799_s6 = int_to_ptr.vmem [resolvable:$true] %s798_s6 }
  0x39   : > { %2350 = dma.hbm_to_vmem [thread:$0]  (!%p3241_p0), %s772_s1, 16, %s774_s22, %s3249_s24  }
  0x3a   : > { %s794_s19 = scalar_lea.hbm %s3572_s12, %s3016_s3  ;;  %s3573_s8 = sld [smem:[#allocation33_spill]] }
  0x3b   : > { %s796_s21 = sshll.u32 %s794_s19, 4  ;;  %s3025_s22 = smov [#allocation6]   ;;  %s797_s21 = int_to_ptr.hbm [resolvable:$true] %s796_s21 }
  0x3c   : > { %2353 = dma.hbm_to_vmem [thread:$0]  (!%p3241_p0), %s797_s21, 16, %s799_s6, %s3249_s24  }
  0x3d   : > { %s621_s1 = sshll.u32 %s3025_s22, 4  ;;  %s3027_s5 = smov 1   ;;  %s622_s1 = int_to_ptr.vmem [resolvable:$true] %s621_s1 }
  0x3e   : > { %s819_s9 = scalar_lea.hbm %s3530_s14, %s3016_s3  ;;  %s816_s11 = scalar_lea.vmem [#allocation16], %s3229_s13 }
  0x3f   : > { %s821_s10 = sshll.u32 %s819_s9, 4  ;;  %s823_s27 = sshll.u32 %s816_s11, 4  ;;  %s822_s10 = int_to_ptr.hbm [resolvable:$true] %s821_s10  ;;  %s824_s27 = int_to_ptr.vmem [resolvable:$true] %s823_s27 }
  0x40   : > { %s619_s7 = sshll.u32 %s3573_s8, 4  ;;  %s3574_s8 = sld [smem:[#allocation34_spill]]  ;;  %s620_s7 = int_to_ptr.hbm [resolvable:$true] %s619_s7 }
  0x41   : > { %2325 = dma.hbm_to_vmem [thread:$0]  (!%p3207_p7), %s620_s7, 32, %s622_s1, [#allocation7], %s3026_s28, %s3026_s28, %s3027_s5  }
  0x42   : > { %2356 = dma.hbm_to_vmem [thread:$0]  (!%p3241_p0), %s822_s10, 16, %s824_s27, %s3249_s24  }
  0x43   : > { %s3028_s7 = smov [#allocation8]   ;;  %s3575_s9 = sld [smem:[#allocation35_spill]] }
  0x44   : > { %s636_s1 = sshll.u32 %s3028_s7, 4  ;;  %s3029_s4 = smov [#allocation9]   ;;  %s637_s1 = int_to_ptr.vmem [resolvable:$true] %s636_s1 }
  0x45   : > { %s647_s10 = sshll.u32 %s3029_s4, 4  ;;  %s3030_s11 = smov 64   ;;  %s648_s10 = int_to_ptr.vmem [resolvable:$true] %s647_s10 }
  0x46   : > { %s634_s22 = sshll.u32 %s3574_s8, 4  ;;  %s3031_s27 = smov 4   ;;  %s635_s22 = int_to_ptr.hbm [resolvable:$true] %s634_s22 }
  0x47   : > { %2328 = dma.hbm_to_vmem [thread:$0]  (!%p3207_p7), %s635_s22, 128, %s637_s1, [#allocation7]  }
  0x48   : > { %s836_s8 = scalar_lea.hbm %s3531_s15, %s3016_s3  ;;  %s833_s28 = scalar_lea.vmem [#allocation17], %s3229_s13 }
  0x49   : > { %s645_s19 = sshll.u32 %s3575_s9, 4  ;;  %s838_s7 = sshll.u32 %s836_s8, 4  ;;  %s646_s19 = int_to_ptr.hbm [resolvable:$true] %s645_s19  ;;  %s839_s7 = int_to_ptr.hbm [resolvable:$true] %s838_s7 }
  0x4a   : > { %2331 = dma.hbm_to_vmem [thread:$0]  (!%p3207_p7), %s646_s19, 128, %s648_s10, [#allocation10], %s3030_s11, %s3030_s11, %s3031_s27  }
  0x4b   : > { %s840_s5 = sshll.u32 %s833_s28, 4  ;;  %s662_s9 = sshll.u32 %s3533_s17, 4  ;;  %s841_s5 = int_to_ptr.vmem [resolvable:$true] %s840_s5  ;;  %s663_s9 = int_to_ptr.hbm [resolvable:$true] %s662_s9 }
  0x4c   : > { %2359 = dma.hbm_to_vmem [thread:$0]  (!%p3241_p0), %s839_s7, 16, %s841_s5, %s3249_s24  }
  0x4d   : > { %s3032_s19 = smov [#allocation19]   ;;  %s677_s21 = sshll.u32 %s3534_s18, 4  ;;  %s678_s21 = int_to_ptr.hbm [resolvable:$true] %s677_s21 }
  0x4e   : > { %s664_s4 = sshll.u32 %s3032_s19, 4  ;;  %s3033_s8 = smov [#allocation20]   ;;  %s665_s4 = int_to_ptr.vmem [resolvable:$true] %s664_s4 }
  0x4f   : > { %2334 = dma.hbm_to_vmem [thread:$0]  (!%p3207_p7), %s663_s9, 256, %s665_s4, [#allocation7], %s3030_s11, %s3030_s11, %s3031_s27  }
  0x50   : > { %s679_s28 = sshll.u32 %s3033_s8, 4  ;;  %s853_s22 = scalar_lea.hbm %s3532_s16, %s3016_s3  ;;  %s680_s28 = int_to_ptr.vmem [resolvable:$true] %s679_s28 }
  0x51   : > { %2337 = dma.hbm_to_vmem [thread:$0]  (!%p3207_p7), %s678_s21, 16, %s680_s28, [#allocation10]  }
  0x52   : > { %s855_s1 = sshll.u32 %s853_s22, 4  ;;  %s850_s12 = scalar_lea.vmem [#allocation18], %s3229_s13  ;;  %s856_s1 = int_to_ptr.hbm [resolvable:$true] %s855_s1 }
  0x53   : > { %s857_s19 = sshll.u32 %s850_s12, 4  ;;  %866 = sbr.rel (%p3199_p5) target bundleno = 2621 (0xa3d), region = 104  ;;  %s858_s19 = int_to_ptr.vmem [resolvable:$true] %s857_s19 }
  0x54   : > { %2362 = dma.hbm_to_vmem [thread:$0]  (!%p3241_p0), %s856_s1, 16, %s858_s19, %s3249_s24  }
  0x58   : > { %2971 = dma.done.wait (%p209_p1), [#allocation4], 256  }
  0x59   : > { %2973 = vsyncadd (%p209_p1), [#allocation4], 4294967040 }
  0x5a   : > { %2975 = dma.done.wait (%p209_p1), [#allocation7], 160  }
  0x5b   : > { %2977 = vsyncadd (%p209_p1), [#allocation7], 4294967136 }
  0x5c   : > { %2979 = dma.done.wait (%p209_p1), [#allocation10], 128  }
  0x5d   : > { %2981 = vsyncadd (%p209_p1), [#allocation10], 4294967168  ;;  %s888_s12 = sand.u32 1, %s3184_s29   ;;  %s3347_s13 = sand.u32 1, %s3004_s25  }
  0x5e   : > { %s889_s23 = scalar_lea.sflag [#allocation4], %s888_s12 }
  0x5f   : > { %2983 = dma.done.wait (%p3192_p4), %s889_s23, 128  }
  0x60   : > { %2985 = vsyncadd (%p3192_p4), %s889_s23, 4294967168 }
  0x61   : > { %2987 = dma.done.wait (%p209_p1), [#allocation7], 256  }
  0x62   : > { %2989 = vsyncadd (%p209_p1), [#allocation7], 4294967040 }
  0x63   : > { %2991 = dma.done.wait (%p209_p1), [#allocation10], 16  }
  0x64   : > { %2993 = vsyncadd (%p209_p1), [#allocation10], 4294967280  ;;  %s3576_s0 = sld [smem:[#allocation29_spill]] }
  0x65   : > { %s3577_s5 = sld [smem:[#allocation37_spill]] }
  0x66   : > { %s3578_s12 = sld [smem:[#allocation39_spill]] }
  0x67   : > { %s3579_s9 = sld [smem:[#allocation43_spill]] }
  0x68   : > { %s3580_s20 = sld [smem:[#allocation45_spill]] }
  0x6a   : > { %p1068_p2 = scmp.lt.s32.totalorder %s3576_s0, 1  ;;  %p2174_p1 = scmp.ne.s32.totalorder %s3576_s0, 0 }
  0x6b   : > { %s3581_s10 = sld [smem:[#allocation36_spill]] (!%p2174_p1) }
  0x6c   : > { %s1069_s6 = scalar_select %p1068_p2, %s3576_s0, 1 }
  0x6d   : > { %1093 = sbr.rel (%p2174_p1) target bundleno = 260 (0x104), region = 164 }
  0x6e   : > { %s2256_s21 = sshll.u32 %s1069_s6, 4  ;;  %s2259_s8 = sshll.u32 %s1069_s6, 5 }
  0x6f   : > { %s1072_s22 = scalar_lea.vmem %s3577_s5, %s2256_s21  ;;  %s3377_s23 = scalar_lea.vmem %s3578_s12, %s2256_s21 }
  0x70   : > { %s3382_s27 = scalar_lea.vmem %s3579_s9, %s2256_s21  ;;  %s3387_s2 = scalar_lea.vmem %s3580_s20, %s2259_s8 }
  0x72   : > { %v2177_v0 = vld [vmem:[#allocation9] sm:$0xf]  ;;  %v2260_v1 = vld [vmem:[#allocation9] sm:$0x30]  ;;  %vm1112_vm0 = vcmask 1045504   ;;  %v1094_v2 = vld [vmem:[#allocation3] sm:$0xff] }
  0x73   : > { %v2178_v3 = vor.u32 %v2260_v1, %v2177_v0  ;;  %v1095_v4 = vld [vmem:[#allocation3 + $0x8] sm:$0xff]  ;;  %vm1108_vm1 = vcmask 97280   ;;  %v2449_v7 = vld [vmem:[%s3581_s10] ss:$0 sm:$0xff]  ;;  %v1130_v9 = vld [vmem:[#allocation8] sm:$0xff]  ;;  %vm1133_vm2 = vcmask 261120  }
  0x74   : > { %v1096_v6 = vpack.c.bf16 %v1095_v4, %v1094_v2 }
  0x75   : > { %v1114_v5 = vsel %vm1112_vm0, %v2178_v3, 0 }
  0x76   : > { %1123 = vmatpush.bf16.msra.mxu0 %v1114_v5 }
  0x79   : > { %2179 = vmatmul.msk.bf16.vlgmr.msra.gmra.mxu0 %vm1108_vm1, %v1096_v6 }
  0xf6   : > { %v1125_v8 = vpop.f32.mrf.mxu0 }
  0xf7   : > { %v1126_v10 = vadd.f32 %v2449_v7, %v1125_v8 }
  0xf9   : > { %v1131_v11 = vadd.f32 %v1130_v9, %v1126_v10 }
  0xfb   : > { %1134 = vst.msk [vmem:[#allocation2] sm:$0xff] %vm1133_vm2, %v1131_v11 }
  0xfe   : > { %v1127_v12 = vpop.f32.mrf.mxu0 }
  0xff   : > { %v1128_v13 = vadd.f32 %v2449_v7, %v1127_v12 }
 0x101   : > { %v1132_v14 = vadd.f32 %v1130_v9, %v1128_v13 }
 0x103   : > { %1135 = vst.msk [vmem:[#allocation2 + $0x8] sm:$0xff] %vm1133_vm2, %v1132_v14 }
 0x104 PF: > { %v2262_v15 = vld [vmem:[%s1072_s22 + $0x8] sm:$0xff]  ;;  %v2261_v16 = vld [vmem:[%s1072_s22] sm:$0xff]  ;;  %vm1161_vm3 = vcmask 261120   ;;  %s3582_s20 = scalar_lea.vmem [#allocation11], %s3347_s13  ;;  %s3034_s24 = smov 112   ;;  %vm1196_vm4 = vcmask 130048  }
 0x105   : > { %v3393_v17 = vld [vmem:[#allocation2] sm:$0xff]  ;;  %1171 = vmatpush.bf16.msra.mxu0 %v2262_v15  ;;  %s3035_s11 = smov 80   ;;  %s3036_s0 = smov 96   ;;  %vm1240_vm5 = vcmask 64512   ;;  %vm1270_vm6 = vcmask 1043456   ;;  %vm1632_vm14 = vcmask 523264  }
 0x106   : > { %v2450_v20 = vld [vmem:[%s3582_s20] ss:$0 sm:$0xff]  ;;  %v2452_v50 = vld [vmem:[#allocation6 + $0x1] ss:$0 sm:$0xff]  ;;  %s3037_s6 = smov 64   ;;  %s3038_s21 = smov 48  }
 0x107   : > { %v2451_v41 = vld [vmem:[#allocation6] ss:$0 sm:$0xff]  ;;  %s3583_s8 = scalar_lea.vmem [#allocation12], %s3347_s13  ;;  %s3585_s28 = scalar_lea.vmem [#allocation14], %s3347_s13 }
 0x108   : > { %s3586_s7 = scalar_lea.vmem [#allocation15], %s3347_s13  ;;  %s3588_s5 = scalar_lea.vmem [#allocation17], %s3347_s13 }
 0x109   : > { %1172 = vmatpush.bf16.msra.mxu0 %v2261_v16  ;;  %s3589_s22 = scalar_lea.vmem [#allocation18], %s3347_s13  ;;  %s3590_s1 = sld [smem:[#allocation29_spill]] }
 0x10a   : > { %v3395_v18 = vld [vmem:[#allocation2 + $0x8] sm:$0xff] }
 0x10b   : > { %v1140_v19 = vpack.c.bf16 %v3395_v18, %v3393_v17 }
 0x10d   : > { %2188 = vmatmul.msk.bf16.vlgmr.msra.gmra.mxu0 %vm1161_vm3, %v1140_v19 }
 0x10f   : > { %p2233_p3 = scmp.ne.s32.totalorder %s3590_s1, 1 }
 0x110   : > { %s3591_s12 = sld [smem:[#allocation46_spill]] (!%p2233_p3) }
 0x111   : > { %s3592_s20 = sld [smem:[#allocation47_spill]] (!%p2233_p3) }
 0x18a   : > { %v1174_v21 = vpop.f32.mrf.mxu0 }
 0x18b   : > { %v1175_v22 = vadd.f32 %v2450_v20, %v1174_v21 }
 0x18d   : > { %v1183_v23 = vpack.c.bf16 %v1175_v22, %v1175_v22 }
 0x18f   : > { %v1192_v24 = vunpack.c.l.b16 %v1183_v23 }
 0x191   : > { %v1193_v25 = vpack.c.b16 %v1192_v24, %v1192_v24 }
 0x192   : > { %v1176_v26 = vpop.f32.mrf.mxu0 }
 0x193   : > { %v1177_v27 = vadd.f32 %v2450_v20, %v1176_v26  ;;  %1309 = vrot.lane.b32.xlu2 %v1193_v25, %s3034_s24  ;;  %1311 = vrot.lane.b32.xlu1 %v1193_v25, %s3035_s11 }
 0x194   : > { %1194 = vrot.lane.b32.xlu0 %v1193_v25, %s3036_s0 }
 0x195   : > { %v1184_v28 = vpack.c.bf16 %v1177_v27, %v1177_v27 }
 0x197   : > { %v1217_v29 = vunpack.c.l.b16 %v1184_v28 }
 0x199   : > { %v3402_v30 = vpack.c.b16 %v1217_v29, %v1217_v29 }
 0x19b   : > { %1332 = vrot.lane.b32.xlu2 %v3402_v30, %s3034_s24  ;;  %1334 = vrot.lane.b32.xlu1 %v3402_v30, %s3035_s11  ;;  %s3041_s24 = smov (!%p2233_p3), 32  }
 0x19c   : > { %1219 = vrot.lane.b32.xlu0 %v3402_v30, %s3036_s0 }
 0x1ed   : > { %v1310_v35 = vpop.permute.xlu2 %1309 }
 0x1f5   : > { %v1333_v40 = vpop.permute.xlu2 %1332 }
 0x205   : > { %v1312_v31 = vpop.permute.xlu1 %1311 }
 0x206   : > { %v1195_v32 = vpop.permute.xlu0 %1194  ;;  %v1317_v33 = vsel %vm1196_vm4, %v1312_v31, 0 }
 0x207   : > { %v1201_v34 = vsel %vm1196_vm4, %v1195_v32, 0  ;;  %1326 = vmatpush.bf16.xpose.msrb.mxu0 %v1317_v33 }
 0x208   : > { %1210 = vmatpush.bf16.xpose.msra.mxu1 %v1201_v34 }
 0x20d   : > { %v1335_v36 = vpop.permute.xlu1 %1334 }
 0x20e   : > { %v1220_v37 = vpop.permute.xlu0 %1219  ;;  %2193 = vmatmul.msk.bf16.vlgmr.msrb.gmra.mxu0 %vm1196_vm4, %v1310_v35  ;;  %v1340_v38 = vsel %vm1196_vm4, %v1335_v36, 0 }
 0x20f   : > { %2189 = vmatmul.msk.bf16.vlgmr.msra.gmra.mxu1 %vm1196_vm4, %v1183_v23  ;;  %v1225_v39 = vsel %vm1196_vm4, %v1220_v37, 0 }
 0x210   : > { %1234 = vmatpush.bf16.xpose.msra.mxu2 %v1225_v39  ;;  %1349 = vmatpush.bf16.xpose.msrb.mxu1 %v1340_v38 }
 0x217   : > { %2190 = vmatmul.msk.bf16.vlgmr.msra.gmra.mxu2 %vm1196_vm4, %v1184_v28 }
 0x21f   : > { %2194 = vmatmul.msk.bf16.vlgmr.msrb.gmra.mxu1 %vm1196_vm4, %v1333_v40 }
 0x28b   : > { %v1328_v42 = vpop.f32.mrf.mxu0 }
 0x28c   : > { %v1212_v43 = vpop.f32.mrf.mxu1  ;;  %v1329_v44 = vadd.f32 %v2451_v41, %v1328_v42  ;;  %v2264_v42 = vld [vmem:[%s3377_s23 + $0x8] sm:$0xff] }
 0x28d   : > { %v1213_v45 = vadd.f32 %v2451_v41, %v1212_v43  ;;  %v2263_v41 = vld [vmem:[%s3377_s23] sm:$0xff]  ;;  %1438 = vmatpush.bf16.msra.mxu0 %v2264_v42 }
 0x28e   : > { %v1355_v46 = vsel %vm1240_vm5, %v1329_v44, -inf  ;;  %1461 = vmatpush.bf16.msra.mxu1 %v2263_v41 }
 0x28f   : > { %1356 = vmax.xlane.f32.xlu2 %v1355_v46  ;;  %v1241_v47 = vsel %vm1240_vm5, %v1213_v45, -inf }
 0x290   : > { %1242 = vmax.xlane.f32.xlu0 %v1241_v47 }
 0x293   : > { %v1330_v48 = vpop.f32.mrf.mxu0 }
 0x294   : > { %v1214_v49 = vpop.f32.mrf.mxu1 }
 0x29a   : > { %v1236_v51 = vpop.f32.mrf.mxu2 }
 0x29b   : > { %v1237_v52 = vadd.f32 %v2452_v50, %v1236_v51 }
 0x29c   : > { %v1351_v53 = vpop.f32.mrf.mxu1 }
 0x29d   : > { %v1352_v54 = vadd.f32 %v2452_v50, %v1351_v53  ;;  %v1244_v55 = vsel %vm1240_vm5, %v1237_v52, -inf }
 0x29e   : > { %1245 = vmax.xlane.f32.xlu1 %v1244_v55 }
 0x29f   : > { %v1358_v56 = vsel %vm1240_vm5, %v1352_v54, -inf }
 0x2a0   : > { %1359 = vmax.xlane.f32.xlu2 %v1358_v56 }
 0x2a2   : > { %v1238_v57 = vpop.f32.mrf.mxu2 }
 0x2a4   : > { %v1353_v58 = vpop.f32.mrf.mxu1  ;;  %1287 = vrot.lane.b32.xlu0 %v3402_v30, %s3037_s6 }
 0x2b7   : > { %1265 = vrot.lane.b32.xlu1 %v1193_v25, %s3037_s6 }
 0x2bf   : > { %1379 = vrot.lane.b32.xlu1 %v1193_v25, %s3038_s21 }
 0x302   : > { %v1357_v0 = vpop.xlane.xlu2 %1356 }
 0x303   : > { %v1243_v59 = vpop.xlane.xlu0 %1242  ;;  %v1361_v3 = vsub.f32 %v1329_v44, %v1357_v0 }
 0x304   : > { %v1247_v60 = vsub.f32 %v1213_v45, %v1243_v59 }
 0x305   : > { %v1363_v5 = vmul.f32 1.442695, %v1361_v3 }
 0x306   : > { %v1249_v61 = vmul.f32 1.442695, %v1247_v60 }
 0x308   : > { %2460 = vpow2.f32 %v1249_v61 }
 0x30e   : > { %v2461_v62 = vpop.eup %2460 }
 0x30f   : > { %v1253_v63 = vsel %vm1240_vm5, %v2461_v62, 0.0 }
 0x310   : > { %1254 = vadd.xlane.f32.xlu0 %v1253_v63 }
 0x311   : > { %v1246_v1 = vpop.xlane.xlu1 %1245 }
 0x312   : > { %v1248_v2 = vsub.f32 %v1237_v52, %v1246_v1 }
 0x313   : > { %v1360_v6 = vpop.xlane.xlu2 %1359 }
 0x314   : > { %v1251_v4 = vmul.f32 1.442695, %v1248_v2  ;;  %v1362_v8 = vsub.f32 %v1352_v54, %v1360_v6  ;;  %v2453_v54 = vld [vmem:[%s3583_s8] ss:$0 sm:$0xff]  ;;  %v3039_v2 = vmov 32.0  }
 0x316   : > { %2462 = vpow2.f32 %v1251_v4  ;;  %v1365_v10 = vmul.f32 1.442695, %v1362_v8  ;;  %v1288_v13 = vpop.permute.xlu0 %1287 }
 0x317   : > { %2464 = vpow2.f32 %v1363_v5  ;;  %v1293_v19 = vsel %vm1270_vm6, %v1288_v13, 0 }
 0x318   : > { %2466 = vpow2.f32 %v1365_v10 }
 0x31c   : > { %v2463_v7 = vpop.eup %2462 }
 0x31d   : > { %v1256_v9 = vsel %vm1240_vm5, %v2463_v7, 0.0  ;;  %v2465_v11 = vpop.eup %2464 }
 0x31e   : > { %1257 = vadd.xlane.f32.xlu2 %v1256_v9  ;;  %v1367_v12 = vsel %vm1240_vm5, %v2465_v11, 0.0  ;;  %v2467_v15 = vpop.eup %2466 }
 0x31f   : > { %v1370_v20 = vsel %vm1240_vm5, %v2467_v15, 0.0 }
 0x324   : > { %1400 = vrot.lane.b32.xlu0 %v3402_v30, %s3038_s21 }
 0x326   : > { %1368 = vadd.xlane.f32.xlu2 %v1367_v12 }
 0x329   : > { %v1266_v14 = vpop.permute.xlu1 %1265 }
 0x32a   : > { %v1272_v16 = vsel %vm1270_vm6, %v1266_v14, 0 }
 0x32b   : > { %1281 = vmatpush.bf16.msra.mxu3 %v1272_v16 }
 0x32e   : > { %1371 = vadd.xlane.f32.xlu2 %v1370_v20 }
 0x32f   : > { %1302 = vmatpush.bf16.msrb.mxu3 %v1293_v19  ;;  %v2266_v19 = vld [vmem:[%s3382_s27 + $0x8] sm:$0xff] }
 0x331   : > { %v1380_v21 = vpop.permute.xlu1 %1379 }
 0x332   : > { %v1385_v22 = vsel %vm1270_vm6, %v1380_v21, 0 }
 0x333   : > { %1394 = vmatpush.bf16.msrb.mxu2 %v1385_v22  ;;  %v2265_v22 = vld [vmem:[%s3382_s27] sm:$0xff]  ;;  %s3584_s27 = scalar_lea.vmem [#allocation13], %s3347_s13 }
 0x337   : > { %1569 = vmatpush.bf16.msra.mxu2 %v2266_v19 }
 0x33b   : > { %1570 = vmatpush.bf16.msra.mxu2 %v2265_v22 }
 0x383   : > { %v1255_v23 = vpop.xlane.xlu0 %1254 }
 0x384   : > { %2468 = vrcp.f32 %v1255_v23 }
 0x38a   : > { %v2469_v24 = vpop.eup %2468 }
 0x38b   : > { %v1261_v25 = vmul.f32 %v2469_v24, %v2461_v62 }
 0x38d   : > { %v1263_v26 = vpack.c.bf16 %v1261_v25, %v1261_v25 }
 0x38f   : > { %2191 = vmatmul.msk.bf16.vlgmr.msra.gmra.mxu3 %vm1240_vm5, %v1263_v26 }
 0x391   : > { %v1258_v27 = vpop.xlane.xlu2 %1257 }
 0x392   : > { %2470 = vrcp.f32 %v1258_v27 }
 0x396   : > { %v1401_v28 = vpop.permute.xlu0 %1400 }
 0x397   : > { %v1406_v29 = vsel %vm1270_vm6, %v1401_v28, 0 }
 0x398   : > { %v2471_v30 = vpop.eup %2470  ;;  %1415 = vmatpush.bf16.msra.mxu3 %v1406_v29 }
 0x399   : > { %v1262_v31 = vmul.f32 %v2471_v30, %v2463_v7  ;;  %v1369_v32 = vpop.xlane.xlu2 %1368 }
 0x39a   : > { %2472 = vrcp.f32 %v1369_v32 }
 0x39b   : > { %v1264_v33 = vpack.c.bf16 %v1262_v31, %v1262_v31 }
 0x39f   : > { %2192 = vmatmul.msk.bf16.vlgmr.msrb.gmra.mxu3 %vm1240_vm5, %v1264_v33 }
 0x3a0   : > { %v2473_v34 = vpop.eup %2472 }
 0x3a1   : > { %v1375_v35 = vmul.f32 %v2473_v34, %v2465_v11  ;;  %v1372_v36 = vpop.xlane.xlu2 %1371 }
 0x3a2   : > { %2474 = vrcp.f32 %v1372_v36 }
 0x3a3   : > { %v1377_v37 = vpack.c.bf16 %v1375_v35, %v1375_v35  ;;  %2476 = vrcp.f32 %v3039_v2 }
 0x3a5   : > { %2195 = vmatmul.msk.bf16.vlgmr.msrb.gmra.mxu2 %vm1240_vm5, %v1377_v37 }
 0x3a8   : > { %v2475_v38 = vpop.eup %2474 }
 0x3a9   : > { %v1376_v39 = vmul.f32 %v2475_v38, %v2467_v15  ;;  %v2477_v3 = vpop.eup %2476 }
 0x3aa   : > { %v1485_v4 = vmul.f32 32.0, %v2477_v3  ;;  %vm1489_vm7 = vweird.f32 %v2477_v3 }
 0x3ab   : > { %v1378_v40 = vpack.c.bf16 %v1376_v39, %v1376_v39  ;;  %v2454_v39 = vld [vmem:[%s3584_s27] ss:$0 sm:$0xff] }
 0x3ac   : > { %v1486_v5 = vsub.f32 1.0, %v1485_v4 }
 0x3ae   : > { %v1487_v6 = vmul.f32 %v2477_v3, %v1486_v5 }
 0x3af   : > { %2196 = vmatmul.msk.bf16.vlgmr.msra.gmra.mxu3 %vm1240_vm5, %v1378_v40 }
 0x412   : > { %v1283_v43 = vpop.f32.mrf.mxu3 }
 0x41a   : > { %v1285_v44 = vpop.f32.mrf.mxu3 }
 0x422   : > { %v1304_v45 = vpop.f32.mrf.mxu3 }
 0x423   : > { %v1308_v46 = vpack.c.bf16 %v1304_v45, %v1283_v43  ;;  %v2455_v43 = vld [vmem:[%s3585_s28] ss:$0 sm:$0xff] }
 0x425   : > { %2206 = vmatmul.msk.bf16.vlgmr.msra.gmra.mxu1 %vm1196_vm4, %v1308_v46 }
 0x428   : > { %v1396_v47 = vpop.f32.mrf.mxu2 }
 0x42a   : > { %v1306_v48 = vpop.f32.mrf.mxu3 }
 0x430   : > { %v1398_v49 = vpop.f32.mrf.mxu2 }
 0x432   : > { %v1417_v50 = vpop.f32.mrf.mxu3 }
 0x433   : > { %v1421_v51 = vpack.c.bf16 %v1417_v50, %v1396_v47  ;;  %v2270_v50 = vld [vmem:[%s3387_s2 + $0x18] sm:$0xff] }
 0x434   : > { %1640 = vmatpush.bf16.msrb.mxu3 %v2270_v50 }
 0x435   : > { %2201 = vmatmul.msk.bf16.vlgmr.msra.gmra.mxu0 %vm1196_vm4, %v1421_v51  ;;  %v2269_v51 = vld [vmem:[%s3387_s2 + $0x10] sm:$0xff] }
 0x438   : > { %1641 = vmatpush.bf16.msrb.mxu3 %v2269_v51 }
 0x43a   : > { %v1419_v52 = vpop.f32.mrf.mxu3 }
 0x43b   : > { %v2268_v52 = vld [vmem:[%s3387_s2 + $0x8] sm:$0xff] }
 0x43c   : > { %1642 = vmatpush.bf16.msrb.mxu3 %v2268_v52 }
 0x4a2   : > { %v1463_v53 = vpop.f32.mrf.mxu1 }
 0x4aa   : > { %v1465_v60 = vpop.f32.mrf.mxu1 }
 0x4b2   : > { %v1440_v55 = vpop.f32.mrf.mxu0 }
 0x4b3   : > { %v1464_v56 = vadd.f32 %v1463_v53, %v1440_v55  ;;  %v2267_v53 = vld [vmem:[%s3387_s2] sm:$0xff]  ;;  %s3587_s2 = scalar_lea.vmem [#allocation16], %s3347_s13 }
 0x4b4   : > { %1643 = vmatpush.bf16.msrb.mxu3 %v2267_v53 }
 0x4b5   : > { %v1472_v57 = vadd.f32 %v2453_v54, %v1464_v56 }
 0x4b7   : > { %v1474_v58 = vadd.f32 %v1472_v57, %v3393_v17  ;;  %v1488_v17 = vadd.f32 %v2477_v3, %v1487_v6 }
 0x4b9   : > { %v1478_v59 = vsel %vm1161_vm3, %v1474_v58, 0.0  ;;  %v3443_v7 = vsel %vm1489_vm7, %v2477_v3, %v1488_v17 }
 0x4ba   : > { %1479 = vadd.xlane.f32.xlu2 %v1478_v59  ;;  %v1442_v61 = vpop.f32.mrf.mxu0 }
 0x4bb   : > { %v1466_v62 = vadd.f32 %v1465_v60, %v1442_v61 }
 0x4bd   : > { %v1473_v63 = vadd.f32 %v2453_v54, %v1466_v62  ;;  %v2456_v54 = vld [vmem:[%s3586_s7] ss:$0 sm:$0xff] }
 0x4bf   : > { %v1475_v0 = vadd.f32 %v1473_v63, %v3395_v18 }
 0x4c1   : > { %v1481_v1 = vsel %vm1161_vm3, %v1475_v0, 0.0 }
 0x4c2   : > { %1482 = vadd.xlane.f32.xlu1 %v1481_v1 }
 0x52d   : > { %v1480_v8 = vpop.xlane.xlu2 %1479 }
 0x52e   : > { %v1491_v9 = vmul.f32 %v3443_v7, %v1480_v8 }
 0x530   : > { %v1493_v10 = vsub.f32 %v1474_v58, %v1491_v9 }
 0x532   : > { %v1495_v18 = vmul.f32 %v1493_v10, %v1493_v10 }
 0x534   : > { %v1497_v11 = vsel %vm1161_vm3, %v1495_v18, 0.0 }
 0x535   : > { %1498 = vadd.xlane.f32.xlu0 %v1497_v11  ;;  %v1483_v12 = vpop.xlane.xlu1 %1482 }
 0x536   : > { %v1492_v13 = vmul.f32 %v3443_v7, %v1483_v12 }
 0x538   : > { %v1494_v14 = vsub.f32 %v1475_v0, %v1492_v13  ;;  %v2457_v13 = vld [vmem:[%s3587_s2] ss:$0 sm:$0xff] }
 0x53a   : > { %v1496_v15 = vmul.f32 %v1494_v14, %v1494_v14 }
 0x53c   : > { %v1500_v16 = vsel %vm1161_vm3, %v1496_v15, 0.0 }
 0x53d   : > { %1501 = vadd.xlane.f32.xlu2 %v1500_v16 }
 0x5a8   : > { %v1499_v20 = vpop.xlane.xlu0 %1498 }
 0x5a9   : > { %v1503_v21 = vmul.f32 %v1499_v20, %v3443_v7 }
 0x5ab   : > { %v1505_v23 = vadd.f32 1e-05, %v1503_v21 }
 0x5ad   : > { %2478 = vrsqrt.f32 %v1505_v23  ;;  %vm1513_vm9 = vweird.f32 %v1505_v23 }
 0x5b0   : > { %v1502_v24 = vpop.xlane.xlu2 %1501 }
 0x5b1   : > { %v1504_v25 = vmul.f32 %v1502_v24, %v3443_v7 }
 0x5b3   : > { %v2479_v26 = vpop.eup %2478  ;;  %v1506_v27 = vadd.f32 1e-05, %v1504_v25 }
 0x5b4   : > { %v1508_v28 = vmul.f32 %v2479_v26, %v1505_v23  ;;  %vm1514_vm8 = vweird.f32 %v2479_v26 }
 0x5b5   : > { %2480 = vrsqrt.f32 %v1506_v27  ;;  %vm1515_vm10 = vmor %vm1513_vm9, %vm1514_vm8  ;;  %vm1523_vm12 = vweird.f32 %v1506_v27 }
 0x5b6   : > { %v1509_v29 = vmul.f32 %v2479_v26, %v1508_v28 }
 0x5b8   : > { %v1510_v30 = vmul.f32 0.5, %v1509_v29 }
 0x5ba   : > { %v1511_v31 = vsub.f32 1.5, %v1510_v30 }
 0x5bb   : > { %v2481_v32 = vpop.eup %2480 }
 0x5bc   : > { %v1512_v33 = vmul.f32 %v2479_v26, %v1511_v31  ;;  %v1518_v34 = vmul.f32 %v2481_v32, %v1506_v27  ;;  %vm1524_vm11 = vweird.f32 %v2481_v32 }
 0x5bd   : > { %vm1525_vm13 = vmor %vm1523_vm12, %vm1524_vm11 }
 0x5be   : > { %v1519_v35 = vmul.f32 %v2481_v32, %v1518_v34  ;;  %v1516_v36 = vsel %vm1515_vm10, %v2479_v26, %v1512_v33 }
 0x5bf   : > { %v1527_v40 = vmul.f32 %v1516_v36, %v1493_v10 }
 0x5c0   : > { %v1520_v37 = vmul.f32 0.5, %v1519_v35 }
 0x5c1   : > { %v1532_v44 = vmul.f32 %v2454_v39, %v1527_v40 }
 0x5c2   : > { %v1521_v38 = vsub.f32 1.5, %v1520_v37 }
 0x5c3   : > { %v1537_v47 = vadd.f32 %v2455_v43, %v1532_v44 }
 0x5c4   : > { %v1522_v41 = vmul.f32 %v2481_v32, %v1521_v38 }
 0x5c6   : > { %v1526_v42 = vsel %vm1525_vm13, %v2481_v32, %v1522_v41 }
 0x5c7   : > { %v1528_v45 = vmul.f32 %v1526_v42, %v1494_v14 }
 0x5c9   : > { %v1533_v46 = vmul.f32 %v2454_v39, %v1528_v45 }
 0x5cb   : > { %v1538_v48 = vadd.f32 %v2455_v43, %v1533_v46 }
 0x5cd   : > { %v1539_v49 = vpack.c.bf16 %v1538_v48, %v1537_v47 }
 0x5cf   : > { %2215 = vmatmul.msk.bf16.vlgmr.msra.gmra.mxu2 %vm1161_vm3, %v1539_v49 }
 0x652   : > { %v1572_v55 = vpop.f32.mrf.mxu2 }
 0x653   : > { %v1573_v56 = vadd.f32 %v2456_v54, %v1572_v55 }
 0x655   : > { %v1579_v57 = vmul.f32 0.044715, %v1573_v56  ;;  %v1577_v8 = vmul.f32 0.5, %v1573_v56 }
 0x657   : > { %v1581_v58 = vmul.f32 %v1579_v57, %v1573_v56 }
 0x659   : > { %v1583_v59 = vmul.f32 %v1581_v58, %v1573_v56 }
 0x65a   : > { %v1574_v60 = vpop.f32.mrf.mxu2 }
 0x65b   : > { %v1585_v61 = vadd.f32 %v1583_v59, %v1573_v56  ;;  %v1575_v62 = vadd.f32 %v2456_v54, %v1574_v60 }
 0x65d   : > { %v1580_v63 = vmul.f32 0.044715, %v1575_v62  ;;  %v1587_v0 = vmul.f32 0.7978846, %v1585_v61  ;;  %v1578_v9 = vmul.f32 0.5, %v1575_v62 }
 0x65f   : > { %v1582_v1 = vmul.f32 %v1580_v63, %v1575_v62  ;;  %2482 = vtanh.f32 %v1587_v0 }
 0x661   : > { %v1584_v2 = vmul.f32 %v1582_v1, %v1575_v62 }
 0x663   : > { %v1586_v3 = vadd.f32 %v1584_v2, %v1575_v62 }
 0x665   : > { %v1588_v4 = vmul.f32 0.7978846, %v1586_v3  ;;  %v2483_v5 = vpop.eup %2482 }
 0x666   : > { %v1591_v6 = vadd.f32 1.0, %v2483_v5 }
 0x667   : > { %2484 = vtanh.f32 %v1588_v4 }
 0x668   : > { %v1593_v18 = vmul.f32 %v1591_v6, %v1577_v8 }
 0x66d   : > { %v2485_v17 = vpop.eup %2484 }
 0x66e   : > { %v1592_v10 = vadd.f32 1.0, %v2485_v17 }
 0x670   : > { %v1594_v11 = vmul.f32 %v1592_v10, %v1578_v9 }
 0x672   : > { %v1595_v12 = vpack.c.bf16 %v1594_v11, %v1593_v18 }
 0x674   : > { %2232 = vmatmul.msk.bf16.vlgmr.msrb.gmra.mxu3 %vm1632_vm14, %v1595_v12 }
 0x6f7   : > { %v1645_v14 = vpop.f32.mrf.mxu3 }
 0x6f8   : > { %v1646_v15 = vadd.f32 %v2457_v13, %v1645_v14 }
 0x6fa   : > { %v1650_v16 = vadd.f32 %v1646_v15, %v1537_v47 }
 0x6fc   : > { %v1654_v19 = vsel %vm1161_vm3, %v1650_v16, 0.0 }
 0x6fd   : > { %1655 = vadd.xlane.f32.xlu2 %v1654_v19 }
 0x6ff   : > { %v1647_v20 = vpop.f32.mrf.mxu3 }
 0x700   : > { %v1648_v21 = vadd.f32 %v2457_v13, %v1647_v20 }
 0x702   : > { %v1651_v22 = vadd.f32 %v1648_v21, %v1538_v48  ;;  %v2458_v48 = vld [vmem:[%s3588_s5] ss:$0 sm:$0xff] }
 0x704   : > { %v1657_v23 = vsel %vm1161_vm3, %v1651_v22, 0.0 }
 0x705   : > { %1658 = vadd.xlane.f32.xlu2 %v1657_v23 }
 0x770   : > { %v1656_v24 = vpop.xlane.xlu2 %1655 }
 0x771   : > { %v1660_v25 = vmul.f32 %v1656_v24, %v3443_v7 }
 0x773   : > { %v1662_v26 = vsub.f32 %v1650_v16, %v1660_v25 }
 0x775   : > { %v1664_v27 = vmul.f32 %v1662_v26, %v1662_v26 }
 0x777   : > { %v1666_v28 = vsel %vm1161_vm3, %v1664_v27, 0.0 }
 0x778   : > { %1667 = vadd.xlane.f32.xlu2 %v1666_v28  ;;  %v1659_v29 = vpop.xlane.xlu2 %1658 }
 0x779   : > { %v1661_v30 = vmul.f32 %v1659_v29, %v3443_v7 }
 0x77b   : > { %v1663_v31 = vsub.f32 %v1651_v22, %v1661_v30 }
 0x77d   : > { %v1665_v32 = vmul.f32 %v1663_v31, %v1663_v31 }
 0x77f   : > { %v1669_v33 = vsel %vm1161_vm3, %v1665_v32, 0.0 }
 0x780   : > { %1670 = vadd.xlane.f32.xlu2 %v1669_v33 }
 0x7eb   : > { %v1668_v34 = vpop.xlane.xlu2 %1667 }
 0x7ec   : > { %v1672_v35 = vmul.f32 %v1668_v34, %v3443_v7 }
 0x7ee   : > { %v1674_v36 = vadd.f32 1e-05, %v1672_v35 }
 0x7f0   : > { %2486 = vrsqrt.f32 %v1674_v36  ;;  %vm1682_vm0 = vweird.f32 %v1674_v36 }
 0x7f3   : > { %v1671_v37 = vpop.xlane.xlu2 %1670 }
 0x7f4   : > { %v1673_v38 = vmul.f32 %v1671_v37, %v3443_v7  ;;  %v2459_v7 = vld [vmem:[%s3589_s22] ss:$0 sm:$0xff] }
 0x7f6   : > { %v2487_v39 = vpop.eup %2486  ;;  %v1675_v40 = vadd.f32 1e-05, %v1673_v38 }
 0x7f7   : > { %v1677_v41 = vmul.f32 %v2487_v39, %v1674_v36  ;;  %vm1683_vm15 = vweird.f32 %v2487_v39 }
 0x7f8   : > { %2488 = vrsqrt.f32 %v1675_v40  ;;  %vm1684_vm1 = vmor %vm1682_vm0, %vm1683_vm15  ;;  %vm1692_vm4 = vweird.f32 %v1675_v40 }
 0x7f9   : > { %v1678_v42 = vmul.f32 %v2487_v39, %v1677_v41 }
 0x7fb   : > { %v1679_v43 = vmul.f32 0.5, %v1678_v42 }
 0x7fd   : > { %v1680_v44 = vsub.f32 1.5, %v1679_v43 }
 0x7fe   : > { %v2489_v45 = vpop.eup %2488 }
 0x7ff   : > { %v1681_v46 = vmul.f32 %v2487_v39, %v1680_v44  ;;  %v1687_v47 = vmul.f32 %v2489_v45, %v1675_v40  ;;  %vm1693_vm2 = vweird.f32 %v2489_v45 }
 0x800   : > { %vm1694_vm5 = vmor %vm1692_vm4, %vm1693_vm2 }
 0x801   : > { %v1685_v49 = vsel %vm1684_vm1, %v2487_v39, %v1681_v46  ;;  %v1688_v50 = vmul.f32 %v2489_v45, %v1687_v47 }
 0x802   : > { %v1696_v51 = vmul.f32 %v1685_v49, %v1662_v26 }
 0x803   : > { %v1689_v52 = vmul.f32 0.5, %v1688_v50 }
 0x804   : > { %v1701_v53 = vmul.f32 %v2458_v48, %v1696_v51 }
 0x805   : > { %v1690_v54 = vsub.f32 1.5, %v1689_v52 }
 0x806   : > { %v1706_v55 = vadd.f32 %v2459_v7, %v1701_v53 }
 0x807   : > { %v1691_v56 = vmul.f32 %v2489_v45, %v1690_v54 }
 0x808   : > { %1708 = vst.msk [vmem:[#allocation2] sm:$0xff] %vm1161_vm3, %v1706_v55 }
 0x809   : > { %v1695_v57 = vsel %vm1694_vm5, %v2489_v45, %v1691_v56 }
 0x80a   : > { %v1697_v58 = vmul.f32 %v1695_v57, %v1663_v31 }
 0x80c   : > { %v1702_v59 = vmul.f32 %v2458_v48, %v1697_v58  ;;  %1713 = sbr.rel (%p2233_p3) target bundleno = 2611 (0xa33), region = 168 }
 0x80e   : > { %v1707_v60 = vadd.f32 %v2459_v7, %v1702_v59 }
 0x810   : > { %1709 = vst.msk [vmem:[#allocation2 + $0x8] sm:$0xff] %vm1161_vm3, %v1707_v60 }
 0x811   : > { %v2274_v61 = vld [vmem:[%s3591_s12 + $0x8] sm:$0xff]  ;;  %v1714_v62 = vsel %vm1161_vm3, %v1706_v55, 0.0  ;;  %v1721_v63 = vsel %vm1161_vm3, %v1707_v60, 0.0  ;;  %v3040_v2 = vmov 8.0   ;;  %v2273_v3 = vld [vmem:[%s3591_s12] sm:$0xff]  ;;  %vm1751_vm7 = vcmask 1041409  }
 0x812   : > { %v1715_v0 = vrot.slane %v1714_v62, 4  ;;  %v1722_v1 = vrot.slane %v1721_v63, 4  ;;  %2492 = vrcp.f32 %v3040_v2  ;;  %1808 = vmatpush.bf16.msra.mxu1 %v2274_v61  ;;  %v2490_v29 = vld [vmem:[%s3592_s20] ss:$0 sm:$0xff]  ;;  %vm1815_vm8 = vcmask 254976   ;;  %v2272_v34 = vld [vmem:[#allocation19 + $0x8] sm:$0xff] }
 0x813   : > { %1775 = vmatpush.bf16.msra.mxu0 %v2272_v34  ;;  %v2271_v40 = vld [vmem:[#allocation19] sm:$0xff]  ;;  %v2491_v56 = vld [vmem:[#allocation20] ss:$0 sm:$0xff]  ;;  %vm1857_vm13 = vcmask 516352  }
 0x814   : > { %v1716_v4 = vadd.f32 %v1715_v0, %v1714_v62  ;;  %v1723_v5 = vadd.f32 %v1722_v1, %v1721_v63 }
 0x816   : > { %v1717_v6 = vrot.slane %v1716_v4, 2  ;;  %v1724_v17 = vrot.slane %v1723_v5, 2  ;;  %1809 = vmatpush.bf16.msra.mxu1 %v2273_v3 }
 0x817   : > { %1776 = vmatpush.bf16.msra.mxu0 %v2271_v40 }
 0x818   : > { %v2493_v8 = vpop.eup %2492  ;;  %v1718_v9 = vadd.f32 %v1717_v6, %v1716_v4  ;;  %v1725_v10 = vadd.f32 %v1724_v17, %v1723_v5 }
 0x819   : > { %v1729_v18 = vmul.f32 8.0, %v2493_v8  ;;  %vm1733_vm6 = vweird.f32 %v2493_v8 }
 0x81a   : > { %v1719_v11 = vrot.slane %v1718_v9, 1  ;;  %v1726_v12 = vrot.slane %v1725_v10, 1 }
 0x81b   : > { %v1730_v13 = vsub.f32 1.0, %v1729_v18 }
 0x81c   : > { %v1720_v15 = vadd.f32 %v1719_v11, %v1718_v9  ;;  %v1727_v16 = vadd.f32 %v1726_v12, %v1725_v10 }
 0x81d   : > { %v1731_v14 = vmul.f32 %v2493_v8, %v1730_v13 }
 0x81f   : > { %v1732_v19 = vadd.f32 %v2493_v8, %v1731_v14 }
 0x821   : > { %v1734_v20 = vsel %vm1733_vm6, %v2493_v8, %v1732_v19 }
 0x822   : > { %v1735_v21 = vmul.f32 %v1734_v20, %v1720_v15  ;;  %v1736_v22 = vmul.f32 %v1734_v20, %v1727_v16 }
 0x824   : > { %v1737_v23 = vpack.c.bf16 %v1735_v21, %v1735_v21  ;;  %v1738_v24 = vpack.c.bf16 %v1736_v22, %v1736_v22 }
 0x826   : > { %v1749_v25 = vunpack.c.l.b16 %v1737_v23  ;;  %v1750_v26 = vunpack.c.l.b16 %v1738_v24 }
 0x828   : > { %v1752_v27 = vsel %vm1751_vm7, %v1750_v26, %v1749_v25 }
 0x829   : > { %v1753_v28 = vpack.c.b16 %v1752_v27, %v1752_v27 }
 0x82b   : > { %2251 = vmatmul.msk.bf16.vlgmr.msra.gmra.mxu1 %vm1161_vm3, %v1753_v28  ;;  %2242 = vmatmul.msk.bf16.vlgmr.msra.gmra.mxu0 %vm1161_vm3, %v1753_v28  ;;  %vm1844_vm3 = vcmask 253952  }
 0x8a8   : > { %v1811_v30 = vpop.f32.mrf.mxu1  ;;  %v1778_v57 = vpop.f32.mrf.mxu0 }
 0x8a9   : > { %v1812_v31 = vadd.f32 %v2490_v29, %v1811_v30  ;;  %v1779_v58 = vadd.f32 %v2491_v56, %v1778_v57 }
 0x8ab   : > { %v1816_v32 = vsel %vm1815_vm8, %v1812_v31, -inf  ;;  %v1842_v59 = vrot.slane %v1779_v58, 1  ;;  %1845 = vst.msk [vmem:[#allocation21] sm:$0x1] %vm1844_vm3, %v1779_v58 }
 0x8ac   : > { %1817 = vmax.xlane.f32.xlu0 %v1816_v32 }
 0x8ad   : > { %1846 = vst.msk [vmem:[#allocation21 + $0x1] sm:$0x1] %vm1844_vm3, %v1842_v59 }
 0x8b0   : > { %v1813_v33 = vpop.f32.mrf.mxu1  ;;  %v1780_v60 = vpop.f32.mrf.mxu0 }
 0x91f   : > { %v1818_v35 = vpop.xlane.xlu0 %1817 }
 0x920   : > { %v1819_v36 = vsub.f32 %v1812_v31, %v1818_v35 }
 0x922   : > { %v1820_v37 = vmul.f32 1.442695, %v1819_v36 }
 0x924   : > { %2494 = vpow2.f32 %v1820_v37 }
 0x92a   : > { %v2495_v38 = vpop.eup %2494 }
 0x92b   : > { %v1822_v39 = vsel %vm1815_vm8, %v2495_v38, 0.0 }
 0x92c   : > { %1823 = vadd.xlane.f32.xlu0 %v1822_v39 }
 0x99f   : > { %v1824_v41 = vpop.xlane.xlu0 %1823 }
 0x9a0   : > { %2496 = vrcp.f32 %v1824_v41  ;;  %v1836_v45 = vand.u32 2147483648, %v1824_v41  ;;  %v1834_v47 = vand.u32 2147483647, %v1824_v41  ;;  %vm1830_vm10 = vweird.f32 %v1824_v41 }
 0x9a2   : > { %v1837_v49 = vor.u32 1.1754944e-38, %v1836_v45  ;;  %vm1835_vm12 = vcmp.eq.f32.partialorder %v1834_v47, 8.507059e+37 }
 0x9a6   : > { %v2497_v42 = vpop.eup %2496 }
 0x9a7   : > { %v1826_v43 = vmul.f32 %v2497_v42, %v1824_v41  ;;  %vm1831_vm9 = vweird.f32 %v2497_v42 }
 0x9a8   : > { %vm1832_vm11 = vmor %vm1830_vm10, %vm1831_vm9 }
 0x9a9   : > { %v1827_v44 = vsub.f32 1.0, %v1826_v43 }
 0x9ab   : > { %v1828_v46 = vmul.f32 %v2497_v42, %v1827_v44 }
 0x9ad   : > { %v1829_v48 = vadd.f32 %v2497_v42, %v1828_v46 }
 0x9af   : > { %v1833_v50 = vsel %vm1832_vm11, %v2497_v42, %v1829_v48 }
 0x9b0   : > { %v1838_v7 = vsel %vm1835_vm12, %v1837_v49, %v1833_v50 }
 0x9b1   : > { %v1839_v51 = vmul.f32 %v2495_v38, %v1838_v7 }
 0x9b3   : > { %v1840_v52 = vadd.f32 1e-06, %v1839_v51 }
 0x9b5   : > { %v1849_v53 = vperm.slane %v1840_v52, 0  ;;  %v1848_v54 = vrot.slane %v1840_v52, 1 }
 0x9b7   : > { %1851 = vrot.lane.b32.xlu1 %v1849_v53, %s3041_s24  ;;  %v1850_v55 = vperm.slane %v1848_v54, 0 }
 0x9bf   : > { %1853 = vrot.lane.b32.xlu1 %v1850_v55, %s3041_s24 }
 0xa29   : > { %v1852_v61 = vpop.permute.xlu1 %1851 }
 0xa2a   : > { %1858 = vst.msk [vmem:[#allocation21] sm:$0x1] %vm1857_vm13, %v1852_v61 }
 0xa31   : > { %v1854_v62 = vpop.permute.xlu1 %1853 }
 0xa32   : > { %1859 = vst.msk [vmem:[#allocation21 + $0x1] sm:$0x1] %vm1857_vm13, %v1854_v62 }
 0xa33 PF: > { %p2376_p4 = scmp.eq.s32.totalorder %s3184_s29, 1  ;;  %s3593_s6 = sld [smem:[#allocation48_spill]] }
 0xa34   : > { %s3042_s8 = smov [#allocation21]   ;;  %s3043_s28 = smov 16  }
 0xa35   : > { %s1867_s27 = sshll.u32 %s3042_s8, 4  ;;  %s3044_s7 = smov 1   ;;  %s1868_s27 = int_to_ptr.vmem [resolvable:$true] %s1867_s27 }
 0xa39   : > { %s1869_s21 = sshll.u32 %s3593_s6, 4  ;;  %s1870_s21 = int_to_ptr.hbm [resolvable:$true] %s1869_s21 }
 0xa3a   : > { %2316 = dma.vmem_to_hbm [thread:$0]  (%p2376_p4), %s1868_s27, 32, %s1870_s21, [#allocation5], %s3043_s28, %s3043_s28, %s3044_s7  }
 0xa3b   : > { %2995 = dma.done.wait (%p2376_p4), [#allocation5], 32  }
 0xa3c   : > { %2997 = vsyncadd (%p2376_p4), [#allocation5], 4294967264 }
 0xa3d PF: > { %s3594_s2 = sld [smem:[#allocation30_spill]]  ;;  %s3599_s27 = smov %s3016_s3 }
 0xa3e   : > { %s3595_s29 = sld [smem:[#allocation31_spill]] }
 0xa43   : > { %s35_s28 = sadd.s32 1, %s3594_s2   ;;  %s3596_s2 = smov %s3004_s25 }
 0xa44   : > { %p32_p5 = scmp.ge.s32.totalorder %s35_s28, 4   ;;  %s3597_s25 = smov %s3008_s26 }
 0xa45   : > { %s3598_s26 = smov %s3236_s30  ;;  %s3600_s3 = smov %s3595_s29 }
 0xa46   :  { %34 = sbr.rel (!%p32_p5) target bundleno = 24 (0x18), region = 264 }
 0xa4b   :  { %1886 = vsyncpa [#allocation4], 1 }
 0xa4c   :  { %1888 = vsyncpa [#allocation4 + $0x1], 1 }
 0xa4d   :  { %1889 = vsyncpa [#allocation7], 1 }
 0xa4e   :  { %1890 = vsyncpa [#allocation10], 1 }
 0xa4f   :  { %1891 = vsyncpa [#allocation5], 1 }
 0xa50   :  { %1893 = vsyncpa [#allocation5 + $0x1], 1 }

</bundles_post_ra>
